<compile_context>
chip_gen: v7x
topology: tpu7x:2x2x1
jax: 0.10.0
libtpu: 0.0.40
codegen_flags: <defaults>
</compile_context>

<pallas_src>
import jax
import jax.numpy as jnp
from jax.experimental import pallas as pl
from jax.experimental.pallas import tpu as pltpu


def _round_up(x, m):
    return (x + m - 1) // m * m


# ----------------------------- Pallas kernel ---------------------------------
def _make_conv_bn_relu_kernel(tap_offsets, tile_m, tn, compute_dtype):
    """Kernel closed over static tap offsets (fused shift-and-matmul conv)."""

    def kernel(x_ref, w_ref, bias_ref, o_ref):
        # x_ref:    (1, R, C)       f32  flattened zero-padded NHWC image (row = h*Wp + w)
        # w_ref:    (KH*KW*C, tn)   bf16 BN-scale-folded weight, rows ordered (kh, kw, c)
        # bias_ref: (1, tn)         f32  folded conv-bias + BN shift
        # o_ref:    (1, tile_m, tn) f32  lane-dense (tn is a multiple of 128)
        m = pl.program_id(2)
        base = pl.multiple_of(m * tile_m, tile_m)
        # Implicit im2col: KH*KW statically-offset row slices of the flat image,
        # fused along the contraction dim -> one MXU dot with K = KH*KW*C.
        slices = [x_ref[0, pl.ds(base + off, tile_m), :] for off in tap_offsets]
        patch = jnp.concatenate(slices, axis=-1).astype(compute_dtype)  # (tile_m, KH*KW*C)
        acc = jnp.dot(patch, w_ref[...], preferred_element_type=jnp.float32)
        y = acc + bias_ref[...]                                         # broadcast (1, tn)
        o_ref[0] = jnp.maximum(y, 0.0).astype(o_ref.dtype)

    return kernel


# ----------------------------- wrapper ---------------------------------------
def conv_bn_relu_pallas(x_nchw, weight_oikk, conv_bias, gamma, beta,
                        running_mean, running_var, *, stride=1, padding=1,
                        eps=1e-5, compute_dtype=jnp.bfloat16, tile_m=256):
    """Conv2d + BatchNorm2d(eval) + ReLU.  x_nchw: (N, C, H, W) float32."""
    N, C, H, W = x_nchw.shape
    OC, C_w, KH, KW = weight_oikk.shape
    assert C_w == C

    Hp, Wp = H + 2 * padding, W + 2 * padding
    # Stride-1 output extents; stride > 1 is handled by subsampling afterwards.
    OH1, OW1 = Hp - KH + 1, Wp - KW + 1
    OH = (H + 2 * padding - KH) // stride + 1
    OW = (W + 2 * padding - KW) // stride + 1

    # ---- lane-dense output channels (pad OC to a multiple of 128) ----
    OCp = _round_up(OC, 128)
    # With M tiled to <=256 rows, tn=256 is safe on v6e/v7x; 128 otherwise.
    tn = 256 if OCp % 256 == 0 else 128

    # ---- fold BN (inference) + conv bias ----
    scale = (gamma / jnp.sqrt(running_var + eps)).astype(jnp.float32)       # (OC,)
    bias = (beta + (conv_bias - running_mean) * scale).astype(jnp.float32)  # (OC,)
    w_folded = weight_oikk.astype(jnp.float32) * scale[:, None, None, None]
    # (OC,C,KH,KW) -> (KH,KW,C,OC) -> (KH*KW*C, OC): row order matches the
    # in-kernel patch concatenation order (tap-major, channel-minor).
    w_fused = jnp.transpose(w_folded, (2, 3, 1, 0)).reshape(KH * KW * C, OC)
    w_fused = jnp.pad(w_fused, ((0, 0), (0, OCp - OC))).astype(compute_dtype)
    bias_p = jnp.pad(bias, (0, OCp - OC)).reshape(1, OCp)

    # ---- flatten the padded NHWC image (no im2col expansion in HBM) ----
    # TODO(synk): a real network should keep activations in flattened padded
    # NHWC (and bf16) between layers so this transpose/pad/reshape disappears.
    x_nhwc = jnp.transpose(x_nchw, (0, 2, 3, 1))
    x_pad = jnp.pad(x_nhwc, ((0, 0), (padding, padding),
                             (padding, padding), (0, 0)))
    x_flat = x_pad.reshape(N, Hp * Wp, C).astype(jnp.float32)

    # Stride-1 conv rows: m = oh*Wp + ow.  Columns ow >= OW1 are wrap-around
    # garbage and are sliced off below.
    M = OH1 * Wp
    if M <= tile_m:
        tile_m = _round_up(M, 8)
        m_tiles = 1
    else:
        m_tiles = pl.cdiv(M, tile_m)
    M_total = tile_m * m_tiles

    max_off = (KH - 1) * Wp + (KW - 1)
    R = _round_up(M_total + max_off, 8)          # rows the kernel may touch
    x_flat = jnp.pad(x_flat, ((0, 0), (0, R - Hp * Wp), (0, 0)))

    tap_offsets = tuple(kh * Wp + kw for kh in range(KH) for kw in range(KW))
    kernel = _make_conv_bn_relu_kernel(tap_offsets, tile_m, tn, compute_dtype)

    out = pl.pallas_call(
        kernel,
        out_shape=jax.ShapeDtypeStruct((N, M_total, OCp), jnp.float32),
        grid_spec=pltpu.PrefetchScalarGridSpec(
            num_scalar_prefetch=0,
            # M innermost: output tile changes every step (good pipelining),
            # x block index is constant within a batch (no re-DMA), weights
            # only re-DMA when the OC tile changes.
            grid=(N, OCp // tn, m_tiles),
            in_specs=[
                pl.BlockSpec((1, R, C), lambda n, j, m: (n, 0, 0)),
                pl.BlockSpec((KH * KW * C, tn), lambda n, j, m: (0, j)),
                pl.BlockSpec((1, tn), lambda n, j, m: (0, j)),
            ],
            out_specs=pl.BlockSpec((1, tile_m, tn), lambda n, j, m: (n, m, j)),
        ),
        compiler_params=pltpu.CompilerParams(
            dimension_semantics=("parallel", "parallel", "parallel"),
            # Sized for v7x's 64 MiB physical VMEM; safe on v5e/v6e as well.
            # Raise (and grow tile_m) on v6e/v5e when sweeping for peak.
            vmem_limit_bytes=32 * 1024 * 1024),
    )(x_flat, w_fused, bias_p)

    # Drop pad rows / pad channels / wrap-around columns; back to NCHW.
    out = out[:, :M, :OC].reshape(N, OH1, Wp, OC)[:, :, :OW1, :]
    if stride > 1:
        # TODO(synk): strided conv currently computed at stride 1 then
        # subsampled; an in-kernel strided row index would avoid the 4x work.
        out = out[:, ::stride, ::stride, :]
    assert out.shape == (N, OH, OW, OC)
    # TODO(synk): keep NHWC / bf16 between layers to drop this transpose and
    # halve the output HBM traffic; NCHW f32 kept here to match the module API.
    return jnp.transpose(out, (0, 3, 1, 2))


# ----------------------------- reference (pure JAX) ---------------------------
def conv_bn_relu_ref(x_nchw, weight_oikk, conv_bias, gamma, beta, running_mean,
                     running_var, *, stride=1, padding=1, eps=1e-5):
    y = jax.lax.conv_general_dilated(
        x_nchw, weight_oikk,
        window_strides=(stride, stride),
        padding=[(padding, padding), (padding, padding)],
        dimension_numbers=("NCHW", "OIHW", "NCHW"),
    )
    y = y + conv_bias[None, :, None, None]
    scale = gamma / jnp.sqrt(running_var + eps)
    bias = beta - running_mean * scale
    y = y * scale[None, :, None, None] + bias[None, :, None, None]
    return jnp.maximum(y, 0.0)


if __name__ == "__main__":
    # Small shapes consistent with the module: batch=2, C_in=4, H=W=16,
    # C_out=8, kernel_size=3, stride=1, padding=1.
    N, C, H, W = 2, 4, 16, 16
    OC, K = 8, 3

    key = jax.random.PRNGKey(0)
    k_x, k_w, k_cb, k_g, k_b, k_m, k_v = jax.random.split(key, 7)

    x = jax.random.normal(k_x, (N, C, H, W), dtype=jnp.float32)
    weight = jax.random.normal(k_w, (OC, C, K, K), dtype=jnp.float32) * 0.1
    conv_bias = 0.05 * jax.random.normal(k_cb, (OC,), dtype=jnp.float32)
    gamma = 1.0 + 0.1 * jax.random.normal(k_g, (OC,), dtype=jnp.float32)
    beta = 0.1 * jax.random.normal(k_b, (OC,), dtype=jnp.float32)
    running_mean = 0.1 * jax.random.normal(k_m, (OC,), dtype=jnp.float32)
    running_var = jnp.abs(1.0 + 0.1 * jax.random.normal(k_v, (OC,), dtype=jnp.float32))

    out = conv_bn_relu_pallas(x, weight, conv_bias, gamma, beta, running_mean,
                              running_var, stride=1, padding=1)
    out = jax.block_until_ready(out)

    ref = conv_bn_relu_ref(x, weight, conv_bias, gamma, beta, running_mean,
                           running_var, stride=1, padding=1)
    assert out.shape == (N, OC, H, W), out.shape
    max_err = float(jnp.max(jnp.abs(out - ref)))
    # bf16 MXU operands with f32 accumulation: tolerance sized for bf16 rounding.
    assert jnp.allclose(out, ref, rtol=2e-2, atol=2e-2), max_err

    print("KERNEL_OK")
</pallas_src>

<mosaic_0001>
module attributes {stable_mosaic.version = 11 : i64} {
  func.func @kernel(%arg0: i32, %arg1: i32, %arg2: i32, %arg3: memref<1x552x4xf32, #tpu.memory_space<vmem>>, %arg4: memref<36x128xbf16, #tpu.memory_space<vmem>>, %arg5: memref<1x128xf32, #tpu.memory_space<vmem>>, %arg6: memref<1x256x128xf32, #tpu.memory_space<vmem>>) attributes {dimension_semantics = [#tpu.dimension_semantics<parallel>, #tpu.dimension_semantics<parallel>, #tpu.dimension_semantics<parallel>], iteration_bounds = array<i64: 2, 1, 2>, scalar_prefetch = 0 : i64, scratch_operands = 0 : i64, tpu.core_type = #tpu.core_type<tc>, window_params = [{transform_indices = @transform_0, window_bounds = array<i64: 1, 552, 4>}, {transform_indices = @transform_1, window_bounds = array<i64: 36, 128>}, {transform_indices = @transform_2, window_bounds = array<i64: 1, 128>}, {transform_indices = @transform_3, window_bounds = array<i64: 1, 256, 128>}]} {
    %c256_i32 = arith.constant 256 : i32
    %0 = arith.muli %arg2, %c256_i32 : i32
    %1 = tpu.assume_multiple %0, 256 : i32
    %c0_i32 = arith.constant 0 : i32
    %2 = arith.addi %1, %c0_i32 : i32
    %c0 = arith.constant 0 : index
    %3 = arith.index_cast %2 : i32 to index
    %c0_0 = arith.constant 0 : index
    %4 = vector.load %arg3[%c0, %3, %c0_0] : memref<1x552x4xf32, #tpu.memory_space<vmem>>, vector<1x256x4xf32>
    %5 = vector.shape_cast %4 : vector<1x256x4xf32> to vector<256x4xf32>
    %c1_i32 = arith.constant 1 : i32
    %6 = arith.addi %1, %c1_i32 : i32
    %c0_1 = arith.constant 0 : index
    %7 = arith.index_cast %6 : i32 to index
    %c0_2 = arith.constant 0 : index
    %8 = vector.load %arg3[%c0_1, %7, %c0_2] : memref<1x552x4xf32, #tpu.memory_space<vmem>>, vector<1x256x4xf32>
    %9 = vector.shape_cast %8 : vector<1x256x4xf32> to vector<256x4xf32>
    %c2_i32 = arith.constant 2 : i32
    %10 = arith.addi %1, %c2_i32 : i32
    %c0_3 = arith.constant 0 : index
    %11 = arith.index_cast %10 : i32 to index
    %c0_4 = arith.constant 0 : index
    %12 = vector.load %arg3[%c0_3, %11, %c0_4] : memref<1x552x4xf32, #tpu.memory_space<vmem>>, vector<1x256x4xf32>
    %13 = vector.shape_cast %12 : vector<1x256x4xf32> to vector<256x4xf32>
    %c18_i32 = arith.constant 18 : i32
    %14 = arith.addi %1, %c18_i32 : i32
    %c0_5 = arith.constant 0 : index
    %15 = arith.index_cast %14 : i32 to index
    %c0_6 = arith.constant 0 : index
    %16 = vector.load %arg3[%c0_5, %15, %c0_6] : memref<1x552x4xf32, #tpu.memory_space<vmem>>, vector<1x256x4xf32>
    %17 = vector.shape_cast %16 : vector<1x256x4xf32> to vector<256x4xf32>
    %c19_i32 = arith.constant 19 : i32
    %18 = arith.addi %1, %c19_i32 : i32
    %c0_7 = arith.constant 0 : index
    %19 = arith.index_cast %18 : i32 to index
    %c0_8 = arith.constant 0 : index
    %20 = vector.load %arg3[%c0_7, %19, %c0_8] : memref<1x552x4xf32, #tpu.memory_space<vmem>>, vector<1x256x4xf32>
    %21 = vector.shape_cast %20 : vector<1x256x4xf32> to vector<256x4xf32>
    %c20_i32 = arith.constant 20 : i32
    %22 = arith.addi %1, %c20_i32 : i32
    %c0_9 = arith.constant 0 : index
    %23 = arith.index_cast %22 : i32 to index
    %c0_10 = arith.constant 0 : index
    %24 = vector.load %arg3[%c0_9, %23, %c0_10] : memref<1x552x4xf32, #tpu.memory_space<vmem>>, vector<1x256x4xf32>
    %25 = vector.shape_cast %24 : vector<1x256x4xf32> to vector<256x4xf32>
    %c36_i32 = arith.constant 36 : i32
    %26 = arith.addi %1, %c36_i32 : i32
    %c0_11 = arith.constant 0 : index
    %27 = arith.index_cast %26 : i32 to index
    %c0_12 = arith.constant 0 : index
    %28 = vector.load %arg3[%c0_11, %27, %c0_12] : memref<1x552x4xf32, #tpu.memory_space<vmem>>, vector<1x256x4xf32>
    %29 = vector.shape_cast %28 : vector<1x256x4xf32> to vector<256x4xf32>
    %c37_i32 = arith.constant 37 : i32
    %30 = arith.addi %1, %c37_i32 : i32
    %c0_13 = arith.constant 0 : index
    %31 = arith.index_cast %30 : i32 to index
    %c0_14 = arith.constant 0 : index
    %32 = vector.load %arg3[%c0_13, %31, %c0_14] : memref<1x552x4xf32, #tpu.memory_space<vmem>>, vector<1x256x4xf32>
    %33 = vector.shape_cast %32 : vector<1x256x4xf32> to vector<256x4xf32>
    %c38_i32 = arith.constant 38 : i32
    %34 = arith.addi %1, %c38_i32 : i32
    %c0_15 = arith.constant 0 : index
    %35 = arith.index_cast %34 : i32 to index
    %c0_16 = arith.constant 0 : index
    %36 = vector.load %arg3[%c0_15, %35, %c0_16] : memref<1x552x4xf32, #tpu.memory_space<vmem>>, vector<1x256x4xf32>
    %37 = vector.shape_cast %36 : vector<1x256x4xf32> to vector<256x4xf32>
    %38 = tpu.concatenate %5, %9, %13, %17, %21, %25, %29, %33, %37 in 1 : vector<256x4xf32>, vector<256x4xf32>, vector<256x4xf32>, vector<256x4xf32>, vector<256x4xf32>, vector<256x4xf32>, vector<256x4xf32>, vector<256x4xf32>, vector<256x4xf32> -> vector<256x36xf32>
    %39 = arith.truncf %38 : vector<256x36xf32> to vector<256x36xbf16>
    %c0_17 = arith.constant 0 : index
    %c0_18 = arith.constant 0 : index
    %40 = vector.load %arg4[%c0_17, %c0_18] : memref<36x128xbf16, #tpu.memory_space<vmem>>, vector<36x128xbf16>
    %cst = arith.constant dense<0.000000e+00> : vector<256x128xf32>
    %41 = tpu.matmul %39, %40, %cst {dimension_numbers = #tpu.dot_dimension_numbers<[1], [0], [0], [1], [0, 0, 1, 1], [], []>} : vector<256x36xbf16>, vector<36x128xbf16>, vector<256x128xf32> -> vector<256x128xf32>
    %c0_19 = arith.constant 0 : index
    %c0_20 = arith.constant 0 : index
    %42 = vector.load %arg5[%c0_19, %c0_20] : memref<1x128xf32, #tpu.memory_space<vmem>>, vector<1x128xf32>
    %43 = vector.broadcast %42 : vector<1x128xf32> to vector<256x128xf32>
    %44 = arith.addf %41, %43 : vector<256x128xf32>
    %cst_21 = arith.constant 0.000000e+00 : f32
    %45 = vector.broadcast %cst_21 : f32 to vector<256x128xf32>
    %46 = arith.maximumf %44, %45 : vector<256x128xf32>
    %c0_22 = arith.constant 0 : index
    %c0_23 = arith.constant 0 : index
    %c0_24 = arith.constant 0 : index
    %47 = vector.load %arg6[%c0_22, %c0_23, %c0_24] : memref<1x256x128xf32, #tpu.memory_space<vmem>>, vector<1x256x128xf32>
    %48 = vector.shape_cast %47 : vector<1x256x128xf32> to vector<256x128xf32>
    %49 = vector.shape_cast %46 : vector<256x128xf32> to vector<1x256x128xf32>
    tpu.vector_store %arg6[%c0_22, %c0_23, %c0_24], %49 {strides = array<i32>} : memref<1x256x128xf32, #tpu.memory_space<vmem>>, vector<1x256x128xf32>,
    return
  }
  func.func @transform_0(%arg0: i32, %arg1: i32, %arg2: i32) -> (i32, i32, i32) {
    %c0_i32 = arith.constant 0 : i32
    %c0_i32_0 = arith.constant 0 : i32
    %c0_i32_1 = arith.constant 0 : i32
    return %arg0, %c0_i32, %c0_i32_0 : i32, i32, i32
  }
  func.func @transform_1(%arg0: i32, %arg1: i32, %arg2: i32) -> (i32, i32) {
    %c0_i32 = arith.constant 0 : i32
    %c0_i32_0 = arith.constant 0 : i32
    return %c0_i32, %arg1 : i32, i32
  }
  func.func @transform_2(%arg0: i32, %arg1: i32, %arg2: i32) -> (i32, i32) {
    %c0_i32 = arith.constant 0 : i32
    %c0_i32_0 = arith.constant 0 : i32
    return %c0_i32, %arg1 : i32, i32
  }
  func.func @transform_3(%arg0: i32, %arg1: i32, %arg2: i32) -> (i32, i32, i32) {
    %c0_i32 = arith.constant 0 : i32
    return %arg0, %arg2, %arg1 : i32, i32, i32
  }
}

</mosaic_0001>

<bundles_post_ra>
// kernel: tpu_custom_call.1
= control target key start
LH: loop header
LB: loop body
LE: loop exit
PB: predicated region body
PF: predicated region fallthrough
CT: control target
= control target key end

     0   :  { %8 = vsyncpa [#allocation3], 0  ;;  %s4804_s0 = inlined_call_operand.vmem [shape: f32[2,552,4], index: 0, kind: input, shape index: {}]   ;;  %s4805_s1 = inlined_call_operand.vmem [shape: bf16[36,128], index: 1, kind: input, shape index: {}]   ;;  %s4806_s2 = inlined_call_operand.vmem [shape: f32[1,128], index: 2, kind: input, shape index: {}]   ;;  %s4807_s3 = inlined_call_operand.hbm [shape: f32[2,512,128], index: 3, kind: output, shape index: {}]  }
   0x1   :  { %10 = vsyncpa [#allocation3 + $0x1], 0  ;;  %s3505_s12 = smov 0   ;;  %s3507_s13 = smov 0  }
   0x2   :  { %s3509_s14 = smov 0   ;;  %s3511_s15 = smov 0  }
   0x3   :  { %s3513_s16 = smov 0   ;;  %s3515_s17 = smov 0  }
   0x4   :  { %s3517_s18 = smov 0   ;;  %s3519_s19 = smov 0  }
   0x5 LB: > { %s2290_s20 = sadd.s32 4294967295, %s3473_s19   ;;  %s2291_s21 = sadd.s32 4294967294, %s3473_s19   ;;  %s3473_s19 = sphi %s3519_s19, %s16_s19   ;;  %s3469_s18 = sphi %s3517_s18, %s4896_s18   ;;  %s3465_s17 = sphi %s3515_s17, %s4895_s17   ;;  %s3461_s16 = sphi %s3513_s16, %s4894_s16   ;;  %s3457_s15 = sphi %s3511_s15, %s4893_s15   ;;  %s3453_s14 = sphi %s3509_s14, %s4892_s14   ;;  %s3449_s13 = sphi %s3507_s13, %s4891_s13   ;;  %s3445_s12 = sphi %s3505_s12, %s4890_s12  }
   0x6   : > { %s28_s22 = sadd.s32 1, %s3465_s17  ;;  %s35_s23 = sadd.s32 1, %s3469_s18 }
   0x7   : > { %p29_p0 = scmp.ge.s32.totalorder %s28_s22, 2  ;;  %p134_p1 = scmp.ne.s32.totalorder %s3453_s14, %s3449_s13 }
   0x8   : > { %p135_p2 = scmp.eq.s32.totalorder %s2290_s20, 3  ;;  %p140_p5 = scmp.ne.s32.totalorder %s3449_s13, %s3445_s12 }
   0x9   : > { %s4898_s22 = smov (%p29_p0, %s28_s22), 0  ;;  %s4900_s23 = smov (!%p29_p0, %s35_s23), %s3469_s18 }
   0xa   : > { %s118_s24 = ssub.s32 %s3465_s17, %s4898_s22  ;;  %p3556_p3 = por %p135_p2, %p134_p1 }
   0xb   : > { %p37_p4 = scmp.ge.s32.totalorder %s4900_s23, 2  ;;  %p141_p6 = scmp.eq.s32.totalorder %s2291_s21, 3 }
   0xc   : > { %p2296_p7 = scmp.ge.s32.totalorder %s3473_s19, 1  ;;  %p180_p9 = scmp.lt.s32.totalorder %s3473_s19, 5 }
   0xd   : > { %s4902_s23 = smov (%p37_p4, %s4900_s23), 0  ;;  %p3565_p8 = por %p141_p6, %p140_p5 }
   0xe   : > { %s117_s27 = ssub.s32 %s3469_s18, %s4902_s23  ;;  %s124_s28 = sadd.s32 1, %s3453_s14 }
   0xf   : > { %s119_s29 = sor.u32 %s118_s24, %s117_s27  ;;  %p181_p10 = pnand %p2296_p7, %p180_p9 }
  0x10   : > { %p122_p11 = scmp.eq.s32.totalorder %s119_s29, 0 }
  0x11   : > { %184 = sbr.rel (%p181_p10) target bundleno = 642 (0x282), region = 32 }
  0x12   : > { %s3574_s30 = scalar_select %p122_p11, %s3453_s14, %s124_s28  }
  0x18   : > { %p211_p12 = scmp.lt.s32.totalorder %s3461_s16, 1  ;;  %s2299_s6 = sshll.u32 %s3457_s15, 8  ;;  %vm1911_vm0 = vcmask 1041408   ;;  %vm1555_vm1 = vcmask 31744   ;;  %vm1588_vm2 = vcmask 64512   ;;  %vm1621_vm3 = vcmask 97280  }
  0x19   : > { %s3475_s11 = smov 4   ;;  %s3476_s20 = smov 8   ;;  %vm1654_vm4 = vcmask 130048   ;;  %vm1687_vm5 = vcmask 162816   ;;  %vm1720_vm6 = vcmask 195584   ;;  %vm1753_vm7 = vcmask 228352  }
  0x1a   : > { %s212_s4 = scalar_select %p211_p12, %s3461_s16, 1  ;;  %vm1786_vm8 = vcmask 261120   ;;  %vm1862_vm9 = vcmask 293888  }
  0x1b   : > { %s3477_s21 = smov 12   ;;  %s3478_s24 = smov 16  }
  0x1c   : > { %s2655_s5 = smul.u32 552, %s212_s4  ;;  %s3479_s27 = smov 20  }
  0x1d   : > { %s3480_s4 = smov 24   ;;  %s2585_s29 = sshll.u32 %s3457_s15, 5 }
  0x1e   : > { %s215_s9 = scalar_lea.vmem %s4804_s0, %s2655_s5 }
  0x1f   : > { %s3582_s10 = scalar_lea.vmem %s215_s9, %s2299_s6  ;;  %s3481_s9 = smov 28  }
  0x20   : > { %v2305_v0 = vld [vmem:[%s3582_s10 + $0x21] sm:$0xff]  ;;  %v2306_v1 = vld [vmem:[%s3582_s10 + $0x29] sm:$0xff]  ;;  %v2307_v5 = vld [vmem:[%s3582_s10 + $0x31] sm:$0xff] }
  0x21   : > { %v2301_v2 = vld [vmem:[%s3582_s10 + $0x1] sm:$0xff]  ;;  %v2746_v3 = vpack.i.bf16 %v2306_v1, %v2305_v0  ;;  %v2302_v4 = vld [vmem:[%s3582_s10 + $0x9] sm:$0xff]  ;;  %v2308_v6 = vld [vmem:[%s3582_s10 + $0x39] sm:$0xff] }
  0x22   : > { %v2736_v7 = vpack.i.bf16 %v2302_v4, %v2301_v2  ;;  %v2303_v8 = vld [vmem:[%s3582_s10 + $0x11] sm:$0xff]  ;;  %v2304_v9 = vld [vmem:[%s3582_s10 + $0x19] sm:$0xff]  ;;  %v2751_v10 = vpack.i.bf16 %v2308_v6, %v2307_v5  ;;  %v2309_v14 = vld [vmem:[%s3582_s10 + $0x41] sm:$0xff] }
  0x23   : > { %2747 = vrot.lane.b32.xlu1 %v2746_v3, %s3475_s11  ;;  %v2741_v11 = vpack.i.bf16 %v2304_v9, %v2303_v8  ;;  %v2311_v12 = vld [vmem:[%s3582_s10 + $0x51] sm:$0xff]  ;;  %v2312_v13 = vld [vmem:[%s3582_s10 + $0x59] sm:$0xff]  ;;  %v2310_v15 = vld [vmem:[%s3582_s10 + $0x49] sm:$0xff] }
  0x24   : > { %2737 = vrot.lane.b32.xlu0 %v2736_v7, %s3475_s11  ;;  %v2761_v16 = vpack.i.bf16 %v2312_v13, %v2311_v12  ;;  %v2756_v17 = vpack.i.bf16 %v2310_v15, %v2309_v14  ;;  %v2315_v18 = vld [vmem:[%s3582_s10 + $0x71] sm:$0xff]  ;;  %v2316_v19 = vld [vmem:[%s3582_s10 + $0x79] sm:$0xff]  ;;  %v2313_v20 = vld [vmem:[%s3582_s10 + $0x61] sm:$0xff] }
  0x25   : > { %v2314_v21 = vld [vmem:[%s3582_s10 + $0x69] sm:$0xff]  ;;  %v2771_v22 = vpack.i.bf16 %v2316_v19, %v2315_v18  ;;  %v2319_v24 = vld [vmem:[%s3582_s10 + $0x91] sm:$0xff]  ;;  %v2320_v25 = vld [vmem:[%s3582_s10 + $0x99] sm:$0xff] }
  0x26   : > { %v2766_v23 = vpack.i.bf16 %v2314_v21, %v2313_v20  ;;  %v2317_v26 = vld [vmem:[%s3582_s10 + $0x81] sm:$0xff]  ;;  %v2318_v27 = vld [vmem:[%s3582_s10 + $0x89] sm:$0xff]  ;;  %v2781_v28 = vpack.i.bf16 %v2320_v25, %v2319_v24  ;;  %v2323_v30 = vld [vmem:[%s3582_s10 + $0xb1] sm:$0xff] }
  0x27   : > { %2752 = vrot.lane.b32.xlu1 %v2751_v10, %s3475_s11  ;;  %v2776_v29 = vpack.i.bf16 %v2318_v27, %v2317_v26  ;;  %v2324_v31 = vld [vmem:[%s3582_s10 + $0xb9] sm:$0xff]  ;;  %v2321_v32 = vld [vmem:[%s3582_s10 + $0xa1] sm:$0xff]  ;;  %v2322_v33 = vld [vmem:[%s3582_s10 + $0xa9] sm:$0xff] }
  0x28   : > { %2742 = vrot.lane.b32.xlu0 %v2741_v11, %s3475_s11  ;;  %v2791_v34 = vpack.i.bf16 %v2324_v31, %v2323_v30  ;;  %v2786_v35 = vpack.i.bf16 %v2322_v33, %v2321_v32  ;;  %v2327_v36 = vld [vmem:[%s3582_s10 + $0xd1] sm:$0xff]  ;;  %v2328_v37 = vld [vmem:[%s3582_s10 + $0xd9] sm:$0xff]  ;;  %v2325_v38 = vld [vmem:[%s3582_s10 + $0xc1] sm:$0xff] }
  0x29   : > { %v2326_v39 = vld [vmem:[%s3582_s10 + $0xc9] sm:$0xff]  ;;  %v2801_v40 = vpack.i.bf16 %v2328_v37, %v2327_v36  ;;  %v2331_v42 = vld [vmem:[%s3582_s10 + $0xf1] sm:$0xff]  ;;  %v2332_v43 = vld [vmem:[%s3582_s10 + $0xf9] sm:$0xff] }
  0x2a   : > { %v2796_v41 = vpack.i.bf16 %v2326_v39, %v2325_v38  ;;  %v2329_v44 = vld [vmem:[%s3582_s10 + $0xe1] sm:$0xff]  ;;  %v2330_v45 = vld [vmem:[%s3582_s10 + $0xe9] sm:$0xff]  ;;  %v2811_v46 = vpack.i.bf16 %v2332_v43, %v2331_v42  ;;  %v2336_v48 = vld [vmem:[%s3582_s10 + $0x12] sm:$0xff] }
  0x2b   : > { %2762 = vrot.lane.b32.xlu1 %v2761_v16, %s3475_s11  ;;  %v2806_v47 = vpack.i.bf16 %v2330_v45, %v2329_v44  ;;  %v2337_v49 = vld [vmem:[%s3582_s10 + $0x1a] sm:$0xff]  ;;  %v2334_v50 = vld [vmem:[%s3582_s10 + $0x2] sm:$0xff]  ;;  %v2335_v51 = vld [vmem:[%s3582_s10 + $0xa] sm:$0xff] }
  0x2c   : > { %2757 = vrot.lane.b32.xlu0 %v2756_v17, %s3475_s11  ;;  %v3635_v52 = vpack.i.bf16 %v2337_v49, %v2336_v48  ;;  %v2816_v53 = vpack.i.bf16 %v2335_v51, %v2334_v50  ;;  %v2340_v54 = vld [vmem:[%s3582_s10 + $0x32] sm:$0xff]  ;;  %v2341_v55 = vld [vmem:[%s3582_s10 + $0x3a] sm:$0xff]  ;;  %v2338_v56 = vld [vmem:[%s3582_s10 + $0x22] sm:$0xff] }
  0x2d   : > { %v2339_v57 = vld [vmem:[%s3582_s10 + $0x2a] sm:$0xff]  ;;  %v2831_v58 = vpack.i.bf16 %v2341_v55, %v2340_v54  ;;  %v2344_v60 = vld [vmem:[%s3582_s10 + $0x52] sm:$0xff]  ;;  %v2345_v61 = vld [vmem:[%s3582_s10 + $0x5a] sm:$0xff] }
  0x2e   : > { %v2826_v59 = vpack.i.bf16 %v2339_v57, %v2338_v56  ;;  %v2342_v62 = vld [vmem:[%s3582_s10 + $0x42] sm:$0xff]  ;;  %v2343_v63 = vld [vmem:[%s3582_s10 + $0x4a] sm:$0xff]  ;;  %v2841_v0 = vpack.i.bf16 %v2345_v61, %v2344_v60  ;;  %v2348_v2 = vld [vmem:[%s3582_s10 + $0x72] sm:$0xff] }
  0x2f   : > { %2772 = vrot.lane.b32.xlu1 %v2771_v22, %s3475_s11  ;;  %v2836_v1 = vpack.i.bf16 %v2343_v63, %v2342_v62  ;;  %v2349_v3 = vld [vmem:[%s3582_s10 + $0x7a] sm:$0xff]  ;;  %v2346_v4 = vld [vmem:[%s3582_s10 + $0x62] sm:$0xff]  ;;  %v2347_v5 = vld [vmem:[%s3582_s10 + $0x6a] sm:$0xff] }
  0x30   : > { %2767 = vrot.lane.b32.xlu0 %v2766_v23, %s3475_s11  ;;  %v2851_v6 = vpack.i.bf16 %v2349_v3, %v2348_v2  ;;  %v2846_v7 = vpack.i.bf16 %v2347_v5, %v2346_v4  ;;  %v2352_v8 = vld [vmem:[%s3582_s10 + $0x92] sm:$0xff]  ;;  %v2353_v9 = vld [vmem:[%s3582_s10 + $0x9a] sm:$0xff]  ;;  %v2350_v10 = vld [vmem:[%s3582_s10 + $0x82] sm:$0xff] }
  0x31   : > { %v2351_v11 = vld [vmem:[%s3582_s10 + $0x8a] sm:$0xff]  ;;  %v2861_v12 = vpack.i.bf16 %v2353_v9, %v2352_v8  ;;  %v2356_v14 = vld [vmem:[%s3582_s10 + $0xb2] sm:$0xff]  ;;  %v2357_v15 = vld [vmem:[%s3582_s10 + $0xba] sm:$0xff] }
  0x32   : > { %v2856_v13 = vpack.i.bf16 %v2351_v11, %v2350_v10  ;;  %v2354_v16 = vld [vmem:[%s3582_s10 + $0xa2] sm:$0xff]  ;;  %v2355_v17 = vld [vmem:[%s3582_s10 + $0xaa] sm:$0xff]  ;;  %v2871_v18 = vpack.i.bf16 %v2357_v15, %v2356_v14  ;;  %v2360_v20 = vld [vmem:[%s3582_s10 + $0xd2] sm:$0xff] }
  0x33   : > { %2782 = vrot.lane.b32.xlu1 %v2781_v28, %s3475_s11  ;;  %v2866_v19 = vpack.i.bf16 %v2355_v17, %v2354_v16  ;;  %v2361_v21 = vld [vmem:[%s3582_s10 + $0xda] sm:$0xff]  ;;  %v2358_v22 = vld [vmem:[%s3582_s10 + $0xc2] sm:$0xff]  ;;  %v2359_v23 = vld [vmem:[%s3582_s10 + $0xca] sm:$0xff] }
  0x34   : > { %2777 = vrot.lane.b32.xlu0 %v2776_v29, %s3475_s11  ;;  %v2881_v24 = vpack.i.bf16 %v2361_v21, %v2360_v20  ;;  %v2876_v25 = vpack.i.bf16 %v2359_v23, %v2358_v22  ;;  %v2364_v26 = vld [vmem:[%s3582_s10 + $0xf2] sm:$0xff]  ;;  %v2365_v27 = vld [vmem:[%s3582_s10 + $0xfa] sm:$0xff]  ;;  %v2362_v28 = vld [vmem:[%s3582_s10 + $0xe2] sm:$0xff] }
  0x35   : > { %v2363_v29 = vld [vmem:[%s3582_s10 + $0xea] sm:$0xff]  ;;  %v2891_v30 = vpack.i.bf16 %v2365_v27, %v2364_v26  ;;  %v2397_v32 = vld [vmem:[%s3582_s10 + $0x102] sm:$0xff]  ;;  %v2400_v37 = vld [vmem:[%s3582_s10 + $0x13] sm:$0xff] }
  0x36   : > { %v2886_v31 = vpack.i.bf16 %v2363_v29, %v2362_v28  ;;  %v2398_v33 = vld [vmem:[%s3582_s10 + $0x10a] sm:$0xff]  ;;  %v2401_v38 = vld [vmem:[%s3582_s10 + $0x1b] sm:$0xff]  ;;  %v2404_v43 = vld [vmem:[%s3582_s10 + $0x33] sm:$0xff] }
  0x37   : > { %2792 = vrot.lane.b32.xlu1 %v2791_v34, %s3475_s11  ;;  %v2971_v34 = vpack.i.bf16 %v2398_v33, %v2397_v32  ;;  %v2403_v36 = vld [vmem:[%s3582_s10 + $0x2b] sm:$0xff]  ;;  %v2418_v42 = vld [vmem:[%s3582_s10 + $0xa3] sm:$0xff]  ;;  %v2416_v44 = vld [vmem:[%s3582_s10 + $0x93] sm:$0xff] }
  0x38   : > { %2787 = vrot.lane.b32.xlu0 %v2786_v35, %s3475_s11  ;;  %v2402_v35 = vld [vmem:[%s3582_s10 + $0x23] sm:$0xff]  ;;  %v2405_v49 = vld [vmem:[%s3582_s10 + $0x3b] sm:$0xff]  ;;  %v2419_v50 = vld [vmem:[%s3582_s10 + $0xab] sm:$0xff] }
  0x39   : > { %v2981_v39 = vpack.i.bf16 %v2403_v36, %v2402_v35  ;;  %v2434_v48 = vld [vmem:[%s3582_s10 + $0x1c] sm:$0xff]  ;;  %v2436_v54 = vld [vmem:[%s3582_s10 + $0x2c] sm:$0xff]  ;;  %v2449_v55 = vld [vmem:[%s3582_s10 + $0x94] sm:$0xff] }
  0x3a   : > { %v2450_v56 = vld [vmem:[%s3582_s10 + $0x9c] sm:$0xff]  ;;  %v2452_v60 = vld [vmem:[%s3582_s10 + $0xac] sm:$0xff]  ;;  %v2468_v62 = vld [vmem:[%s3582_s10 + $0x34] sm:$0xff] }
  0x3b   : > { %2802 = vrot.lane.b32.xlu1 %v2801_v40, %s3475_s11  ;;  %v2976_v40 = vpack.i.bf16 %v2401_v38, %v2400_v37  ;;  %v2469_v63 = vld [vmem:[%s3582_s10 + $0x3c] sm:$0xff]  ;;  %v2499_v2 = vld [vmem:[%s3582_s10 + $0x25] sm:$0xff]  ;;  %v2500_v3 = vld [vmem:[%s3582_s10 + $0x2d] sm:$0xff] }
  0x3c   : > { %2797 = vrot.lane.b32.xlu0 %v2796_v41, %s3475_s11  ;;  %v2417_v41 = vld [vmem:[%s3582_s10 + $0x9b] sm:$0xff]  ;;  %v3377_v8 = vld [vmem:[%s4805_s1 + $0x8] sm:$0xff]   ;;  %v3041_v9 = vpack.i.bf16 %v2500_v3, %v2499_v2  ;;  %v3378_v17 = vld [vmem:[%s4805_s1 + $0x10] ss:$0 sps:$4 sm:$0x33]  }
  0x3d   : > { %v2991_v45 = vpack.i.bf16 %v2418_v42, %v2417_v41  ;;  %v2484_v5 = vld [vmem:[%s3582_s10 + $0xb4] sm:$0xff]  ;;  %v2515_v14 = vld [vmem:[%s3582_s10 + $0xa5] sm:$0xff]  ;;  %v1913_v22 = vsel %vm1911_vm0, %v3378_v17, 0 }
  0x3e   : > { %v2501_v11 = vld [vmem:[%s3582_s10 + $0x35] sm:$0xff]  ;;  %v2516_v15 = vld [vmem:[%s3582_s10 + $0xad] sm:$0xff]  ;;  %v2551_v41 = vld [vmem:[%s3582_s10 + $0xbe] sm:$0xff] }
  0x3f   : > { %2812 = vrot.lane.b32.xlu1 %v2811_v46, %s3475_s11  ;;  %v2986_v46 = vpack.i.bf16 %v2416_v44, %v2404_v43  ;;  %v2532_v20 = vld [vmem:[%s3582_s10 + $0x26] sm:$0xff]  ;;  %v2533_v21 = vld [vmem:[%s3582_s10 + $0x2e] sm:$0xff]  ;;  %v2534_v29 = vld [vmem:[%s3582_s10 + $0x36] sm:$0xff] }
  0x40   : > { %2807 = vrot.lane.b32.xlu0 %v2806_v47, %s3475_s11  ;;  %v2433_v47 = vld [vmem:[%s3582_s10 + $0x14] sm:$0xff]  ;;  %v3061_v27 = vpack.i.bf16 %v2533_v21, %v2532_v20  ;;  %v2548_v32 = vld [vmem:[%s3582_s10 + $0xa6] sm:$0xff]  ;;  %s3482_s11 = smov 32  }
  0x41   : > { %v3001_v51 = vpack.i.bf16 %v2434_v48, %v2433_v47  ;;  %v2549_v33 = vld [vmem:[%s3582_s10 + $0xae] sm:$0xff]  ;;  %v2421_v38 = vld [vmem:[%s3582_s10 + $0xbb] sm:$0xff]  ;;  %v2406_v48 = vld [vmem:[%s3582_s10 + $0x43] sm:$0xff] }
  0x42   : > { %v3066_v36 = vpack.i.bf16 %v2549_v33, %v2548_v32  ;;  %v2420_v37 = vld [vmem:[%s3582_s10 + $0xb3] sm:$0xff]  ;;  %v235_v21 = vld [vmem:[%s3582_s10 + $0x40] sm:$0xff] }
  0x43   : > { %2822 = vrot.lane.b32.xlu1 %v3635_v52, %s3476_s20  ;;  %v3081_v43 = vpack.i.bf16 %v2421_v38, %v2420_v37  ;;  %v237_v2 = vld [vmem:[%s3582_s10 + $0x50] sm:$0xff]  ;;  %v238_v3 = vld [vmem:[%s3582_s10 + $0x58] sm:$0xff] }
  0x44   : > { %2817 = vrot.lane.b32.xlu0 %v2816_v53, %s3476_s20  ;;  %v2435_v53 = vld [vmem:[%s3582_s10 + $0x24] sm:$0xff]  ;;  %v2504_v20 = vld [vmem:[%s3582_s10 + $0x4d] sm:$0xff]  ;;  %v2521_v37 = vld [vmem:[%s3582_s10 + $0xd5] sm:$0xff] }
  0x45   : > { %v3011_v57 = vpack.i.bf16 %v2436_v54, %v2435_v53 }
  0x47   : > { %2832 = vrot.lane.b32.xlu1 %v2831_v58, %s3476_s20 }
  0x48   : > { %2827 = vrot.lane.b32.xlu0 %v2826_v59, %s3476_s20 }
  0x4b   : > { %2842 = vrot.lane.b32.xlu1 %v2841_v0, %s3476_s20 }
  0x4c   : > { %2837 = vrot.lane.b32.xlu0 %v2836_v1, %s3476_s20 }
  0x4f   : > { %2852 = vrot.lane.b32.xlu1 %v2851_v6, %s3476_s20 }
  0x50   : > { %2847 = vrot.lane.b32.xlu0 %v2846_v7, %s3476_s20 }
  0x53   : > { %2862 = vrot.lane.b32.xlu1 %v2861_v12, %s3476_s20 }
  0x54   : > { %2857 = vrot.lane.b32.xlu0 %v2856_v13, %s3476_s20 }
  0x57   : > { %2872 = vrot.lane.b32.xlu1 %v2871_v18, %s3476_s20 }
  0x58   : > { %2867 = vrot.lane.b32.xlu0 %v2866_v19, %s3476_s20 }
  0x5b   : > { %2882 = vrot.lane.b32.xlu1 %v2881_v24, %s3476_s20 }
  0x5c   : > { %2877 = vrot.lane.b32.xlu0 %v2876_v25, %s3476_s20 }
  0x5f   : > { %2892 = vrot.lane.b32.xlu1 %v2891_v30, %s3476_s20 }
  0x60   : > { %2887 = vrot.lane.b32.xlu0 %v2886_v31, %s3476_s20 }
  0x63   : > { %2902 = vrot.lane.b32.xlu1 %v2826_v59, %s3477_s21  ;;  %v2451_v59 = vld [vmem:[%s3582_s10 + $0xa4] sm:$0xff] }
  0x64   : > { %2897 = vrot.lane.b32.xlu0 %v3635_v52, %s3477_s21  ;;  %v2996_v52 = vpack.i.bf16 %v2405_v49, %v2419_v50  ;;  %v3016_v61 = vpack.i.bf16 %v2452_v60, %v2451_v59  ;;  %v2407_v49 = vld [vmem:[%s3582_s10 + $0x4b] sm:$0xff] }
  0x65   : > { %v2440_v59 = vld [vmem:[%s3582_s10 + $0x4c] sm:$0xff] }
  0x67   : > { %2912 = vrot.lane.b32.xlu1 %v2836_v1, %s3477_s21  ;;  %v3718_v1 = vpack.i.bf16 %v2469_v63, %v2468_v62 }
  0x68   : > { %2907 = vrot.lane.b32.xlu0 %v2831_v58, %s3477_s21  ;;  %v3006_v58 = vpack.i.bf16 %v2450_v56, %v2449_v55  ;;  %v2455_v55 = vld [vmem:[%s3582_s10 + $0xc4] sm:$0xff]  ;;  %v2456_v56 = vld [vmem:[%s3582_s10 + $0xcc] sm:$0xff] }
  0x6b   : > { %2922 = vrot.lane.b32.xlu1 %v2846_v7, %s3477_s21 }
  0x6c   : > { %2917 = vrot.lane.b32.xlu0 %v2841_v0, %s3477_s21  ;;  %v3376_v0 = vld [vmem:[%s4805_s1] sm:$0xff]  }
  0x6d   : > { %2609 = vmatprep.subr.bf16.mxu0 %v3376_v0  ;;  %2647 = vmatprep.subr.bf16.mxu1 %v3376_v0 }
  0x6e   : > { %2610 = vmatpush3.bf16.msra.mxu0 %v3376_v0  ;;  %2650 = vmatpush3.bf16.msra.mxu1 %v3376_v0 }
  0x6f   : > { %2932 = vrot.lane.b32.xlu1 %v2856_v13, %s3477_s21  ;;  %2611 = vmatprep.subr.bf16.mxu0 %v3377_v8 }
  0x70   : > { %2927 = vrot.lane.b32.xlu0 %v2851_v6, %s3477_s21  ;;  %v2485_v6 = vld [vmem:[%s3582_s10 + $0xbc] sm:$0xff]  ;;  %2648 = vmatprep.subr.bf16.mxu1 %v3377_v8 }
  0x71   : > { %v3735_v10 = vpack.i.bf16 %v2485_v6, %v2484_v5  ;;  %v2488_v5 = vld [vmem:[%s3582_s10 + $0xd4] sm:$0xff]  ;;  %v2489_v6 = vld [vmem:[%s3582_s10 + $0xdc] sm:$0xff] }
  0x72   : > { %2612 = vmatpush3.bf16.msra.mxu0 %v3377_v8  ;;  %2651 = vmatpush3.bf16.msra.mxu1 %v3377_v8 }
  0x73   : > { %2942 = vrot.lane.b32.xlu1 %v2866_v19, %s3477_s21  ;;  %v3046_v19 = vpack.i.bf16 %v2516_v15, %v2515_v14  ;;  %2653 = vmatprep.subr.msk.bf16.mxu0 %vm1911_vm0, %v3378_v17 }
  0x74   : > { %2937 = vrot.lane.b32.xlu0 %v2861_v12, %s3477_s21  ;;  %v2502_v12 = vld [vmem:[%s3582_s10 + $0x3d] sm:$0xff]  ;;  %2654 = vmatprep.subr.msk.bf16.mxu1 %vm1911_vm0, %v3378_v17 }
  0x76   : > { %2614 = vmatpush3.bf16.msra.mxu0 %v1913_v22  ;;  %2652 = vmatpush3.bf16.msra.mxu1 %v1913_v22  ;;  %v236_v22 = vld [vmem:[%s3582_s10 + $0x48] sm:$0xff] }
  0x77   : > { %2952 = vrot.lane.b32.xlu1 %v2876_v25, %s3477_s21  ;;  %v2518_v25 = vld [vmem:[%s3582_s10 + $0xbd] sm:$0xff] }
  0x78   : > { %2947 = vrot.lane.b32.xlu0 %v2871_v18, %s3477_s21  ;;  %v3051_v18 = vpack.i.bf16 %v2502_v12, %v2501_v11  ;;  %v2473_v11 = vld [vmem:[%s3582_s10 + $0x5c] sm:$0xff]  ;;  %v2519_v12 = vld [vmem:[%s3582_s10 + $0xc5] sm:$0xff] }
  0x7b   : > { %2962 = vrot.lane.b32.xlu1 %v2886_v31, %s3477_s21 }
  0x7c   : > { %2957 = vrot.lane.b32.xlu0 %v2881_v24, %s3477_s21  ;;  %v2517_v24 = vld [vmem:[%s3582_s10 + $0xb5] sm:$0xff] }
  0x7d   : > { %v3056_v28 = vpack.i.bf16 %v2518_v25, %v2517_v24 }
  0x7f   : > { %2972 = vrot.lane.b32.xlu1 %v2971_v34, %s3477_s21 }
  0x80   : > { %2967 = vrot.lane.b32.xlu0 %v2891_v30, %s3477_s21  ;;  %v2535_v30 = vld [vmem:[%s3582_s10 + $0x3e] sm:$0xff]  ;;  %s3483_s21 = smov [#allocation2]  }
  0x81   : > { %v3071_v35 = vpack.i.bf16 %v2535_v30, %v2534_v29 }
  0x83   : > { %2982 = vrot.lane.b32.xlu1 %v2981_v39, %s3478_s24 }
  0x84   : > { %2977 = vrot.lane.b32.xlu0 %v2976_v40, %s3478_s24  ;;  %v2550_v40 = vld [vmem:[%s3582_s10 + $0xb6] sm:$0xff] }
  0x85   : > { %v3076_v44 = vpack.i.bf16 %v2551_v41, %v2550_v40 }
  0x87   : > { %2992 = vrot.lane.b32.xlu1 %v2991_v45, %s3478_s24  ;;  %v2422_v45 = vld [vmem:[%s3582_s10 + $0xc3] sm:$0xff] }
  0x88   : > { %2987 = vrot.lane.b32.xlu0 %v2986_v46, %s3478_s24  ;;  %v2423_v46 = vld [vmem:[%s3582_s10 + $0xcb] sm:$0xff] }
  0x8b   : > { %3002 = vrot.lane.b32.xlu1 %v3001_v51, %s3479_s27  ;;  %v3091_v51 = vpack.i.bf16 %v2423_v46, %v2422_v45  ;;  %v2505_v45 = vld [vmem:[%s3582_s10 + $0x55] sm:$0xff]  ;;  %v2506_v46 = vld [vmem:[%s3582_s10 + $0x5d] sm:$0xff] }
  0x8c   : > { %2997 = vrot.lane.b32.xlu0 %v2996_v52, %s3478_s24  ;;  %v3086_v52 = vpack.i.bf16 %v2407_v49, %v2406_v48  ;;  %v241_v48 = vld [vmem:[%s3582_s10 + $0x70] sm:$0xff]  ;;  %v242_v49 = vld [vmem:[%s3582_s10 + $0x78] sm:$0xff] }
  0x8f   : > { %3012 = vrot.lane.b32.xlu1 %v3011_v57, %s3479_s27 }
  0x90   : > { %3007 = vrot.lane.b32.xlu0 %v3006_v58, %s3479_s27  ;;  %v2439_v58 = vld [vmem:[%s3582_s10 + $0x44] sm:$0xff] }
  0x91   : > { %v3106_v62 = vpack.i.bf16 %v2440_v59, %v2439_v58  ;;  %v240_v58 = vld [vmem:[%s3582_s10 + $0x68] sm:$0xff] }
  0x93   : > { %3022 = vrot.lane.b32.xlu1 %v3011_v57, %s3480_s4 }
  0x94   : > { %3017 = vrot.lane.b32.xlu0 %v3016_v61, %s3479_s27 }
  0x95   : > { %v3723_v4 = vpop.permute.xlu1 %2747 }
  0x96   : > { %4822 = vst [vmem:[#allocation5_spill] sm:$0xff] %v3723_v4  ;;  %v3727_v7 = vpop.permute.xlu0 %2737 }
  0x97   : > { %3032 = vrot.lane.b32.xlu1 %v3718_v1, %s3480_s4 }
  0x98   : > { %3027 = vrot.lane.b32.xlu0 %v3016_v61, %s3480_s4  ;;  %v3111_v61 = vpack.i.bf16 %v2456_v56, %v2455_v55 }
  0x99   : > { %v3739_v13 = vpop.permute.xlu1 %2752 }
  0x9a   : > { %4823 = vst [vmem:[#allocation6_spill] sm:$0xff] %v3739_v13  ;;  %v3743_v16 = vpop.permute.xlu0 %2742 }
  0x9b   : > { %3042 = vrot.lane.b32.xlu1 %v3041_v9, %s3481_s9 }
  0x9c   : > { %3037 = vrot.lane.b32.xlu0 %v3735_v10, %s3480_s4 }
  0x9d   : > { %v3753_v23 = vpop.permute.xlu1 %2762 }
  0x9e   : > { %v3757_v26 = vpop.permute.xlu0 %2757  ;;  %v2764_v8 = vunpack.i.l.bf16 %v3753_v23 }
  0x9f   : > { %3052 = vrot.lane.b32.xlu1 %v3051_v18, %s3481_s9  ;;  %v2760_v14 = vunpack.i.h.bf16 %v3757_v26  ;;  %v2759_v15 = vunpack.i.l.bf16 %v3757_v26  ;;  %v2520_v18 = vld [vmem:[%s3582_s10 + $0xcd] sm:$0xff] }
  0xa0   : > { %3047 = vrot.lane.b32.xlu0 %v3046_v19, %s3481_s9  ;;  %v2503_v19 = vld [vmem:[%s3582_s10 + $0x45] sm:$0xff]  ;;  %v1566_v25 = vsel %vm1555_vm1, %v237_v2, %v2764_v8 }
  0xa1   : > { %v3763_v31 = vpop.permute.xlu1 %2772  ;;  %v3136_v29 = vpack.i.bf16 %v2504_v20, %v2503_v19  ;;  %v1564_v30 = vsel %vm1555_vm1, %v235_v21, %v2759_v15  ;;  %v1565_v32 = vsel %vm1555_vm1, %v236_v22, %v2760_v14  ;;  %v2552_v19 = vld [vmem:[%s3582_s10 + $0xc6] sm:$0xff]  ;;  %v2553_v20 = vld [vmem:[%s3582_s10 + $0xce] sm:$0xff] }
  0xa2   : > { %v3767_v34 = vpop.permute.xlu0 %2767  ;;  %v2775_v38 = vunpack.i.h.bf16 %v3763_v31  ;;  %v2774_v40 = vunpack.i.l.bf16 %v3763_v31  ;;  %v239_v31 = vld [vmem:[%s3582_s10 + $0x60] sm:$0xff] }
  0xa3   : > { %3062 = vrot.lane.b32.xlu1 %v3061_v27, %s3482_s11 }
  0xa4   : > { %3057 = vrot.lane.b32.xlu0 %v3056_v28, %s3481_s9  ;;  %v3141_v28 = vpack.i.bf16 %v2520_v18, %v2519_v12  ;;  %v1571_v8 = vsel %vm1555_vm1, %v242_v49, %v2775_v38  ;;  %v2425_v49 = vld [vmem:[%s3582_s10 + $0xdb] sm:$0xff] }
  0xa5   : > { %v3773_v39 = vpop.permute.xlu1 %2782 }
  0xa6   : > { %v3777_v42 = vpop.permute.xlu0 %2777 }
  0xa7   : > { %3072 = vrot.lane.b32.xlu1 %v3071_v35, %s3482_s11 }
  0xa8   : > { %3067 = vrot.lane.b32.xlu0 %v3066_v36, %s3482_s11 }
  0xa9   : > { %v3783_v47 = vpop.permute.xlu1 %2792 }
  0xaa   : > { %4824 = vst [vmem:[#allocation7_spill] sm:$0xff] %v3783_v47  ;;  %v3787_v50 = vpop.permute.xlu0 %2787 }
  0xab   : > { %4825 = vst [vmem:[#allocation8_spill] sm:$0xff] %v3787_v50  ;;  %3082 = vrot.lane.b32.xlu1 %v3081_v43, %s3478_s24 }
  0xac   : > { %3077 = vrot.lane.b32.xlu0 %v3076_v44, %s3482_s11  ;;  %v2522_v44 = vld [vmem:[%s3582_s10 + $0xdd] sm:$0xff] }
  0xad   : > { %v3791_v53 = vpop.permute.xlu1 %2802 }
  0xae   : > { %v3793_v54 = vpop.permute.xlu0 %2797  ;;  %v2804_v38 = vunpack.i.l.bf16 %v3791_v53 }
  0xaf   : > { %3092 = vrot.lane.b32.xlu1 %v3091_v51, %s3478_s24  ;;  %v2770_v51 = vunpack.i.h.bf16 %v3767_v34 }
  0xb0   : > { %3087 = vrot.lane.b32.xlu0 %v3086_v52, %s3478_s24  ;;  %v2769_v52 = vunpack.i.l.bf16 %v3767_v34 }
  0xb1   : > { %v3799_v57 = vpop.permute.xlu1 %2812  ;;  %v1569_v14 = vsel %vm1555_vm1, %v240_v58, %v2770_v51  ;;  %v2408_v51 = vld [vmem:[%s3582_s10 + $0x53] sm:$0xff]  ;;  %v252_v58 = vld [vmem:[%s3582_s10 + $0xc8] sm:$0xff] }
  0xb2   : > { %v3803_v60 = vpop.permute.xlu0 %2807  ;;  %v1568_v12 = vsel %vm1555_vm1, %v239_v31, %v2769_v52  ;;  %v2409_v52 = vld [vmem:[%s3582_s10 + $0x5b] sm:$0xff] }
  0xb3   : > { %3102 = vrot.lane.b32.xlu1 %v3735_v10, %s3479_s27  ;;  %v2472_v10 = vld [vmem:[%s3582_s10 + $0x54] sm:$0xff]  ;;  %v251_v31 = vld [vmem:[%s3582_s10 + $0xc0] sm:$0xff] }
  0xb4   : > { %3097 = vrot.lane.b32.xlu0 %v3718_v1, %s3479_s27  ;;  %v2765_v1 = vunpack.i.h.bf16 %v3753_v23  ;;  %v3836_v23 = vpack.i.bf16 %v2489_v6, %v2488_v5  ;;  %v3839_v24 = vpack.i.bf16 %v2473_v11, %v2472_v10  ;;  %v3151_v5 = vpack.i.bf16 %v2522_v44, %v2521_v37  ;;  %v2424_v44 = vld [vmem:[%s3582_s10 + $0xd3] sm:$0xff] }
  0xb5   : > { %v3809_v63 = vpop.permute.xlu1 %2822  ;;  %v3146_v6 = vpack.i.bf16 %v2506_v46, %v2505_v45  ;;  %v2805_v37 = vunpack.i.h.bf16 %v3791_v53  ;;  %v2800_v45 = vunpack.i.h.bf16 %v3793_v54  ;;  %v2799_v46 = vunpack.i.l.bf16 %v3793_v54 }
  0xb6   : > { %v3811_v0 = vpop.permute.xlu0 %2817  ;;  %v1567_v26 = vsel %vm1555_vm1, %v238_v3, %v2765_v1  ;;  %v1570_v1 = vsel %vm1555_vm1, %v241_v48, %v2774_v40  ;;  %v2825_v50 = vunpack.i.h.bf16 %v3809_v63 }
  0xb7   : > { %3112 = vrot.lane.b32.xlu1 %v3111_v61, %s3479_s27  ;;  %v2819_v47 = vunpack.i.l.bf16 %v3811_v0 }
  0xb8   : > { %3107 = vrot.lane.b32.xlu0 %v3106_v62, %s3479_s27 }
  0xb9   : > { %v3821_v9 = vpop.permute.xlu1 %2832 }
  0xba   : > { %4826 = vst [vmem:[#allocation9_spill] sm:$0xff] %v3821_v9  ;;  %v3828_v17 = vpop.permute.xlu0 %2827 }
  0xbb   : > { %4827 = vst [vmem:[#allocation10_spill] sm:$0xff] %v3828_v17  ;;  %3122 = vrot.lane.b32.xlu1 %v3111_v61, %s3480_s4 }
  0xbc   : > { %3117 = vrot.lane.b32.xlu0 %v3106_v62, %s3480_s4 }
  0xbd   : > { %v2843_v27 = vpop.permute.xlu1 %2842 }
  0xbe   : > { %v2845_v33 = vunpack.i.h.bf16 %v2843_v27  ;;  %v2844_v35 = vunpack.i.l.bf16 %v2843_v27  ;;  %v2838_v36 = vpop.permute.xlu0 %2837  ;;  %v2537_v27 = vld [vmem:[%s3582_s10 + $0x4e] sm:$0xff] }
  0xbf   : > { %v2840_v41 = vunpack.i.h.bf16 %v2838_v36  ;;  %v2839_v43 = vunpack.i.l.bf16 %v2838_v36  ;;  %3132 = vrot.lane.b32.xlu1 %v3836_v23, %s3480_s4  ;;  %v2555_v36 = vld [vmem:[%s3582_s10 + $0xde] sm:$0xff] }
  0xc0   : > { %v3858_v55 = vsel %vm1588_vm2, %v1566_v25, %v2844_v35  ;;  %v3861_v56 = vsel %vm1588_vm2, %v1567_v26, %v2845_v33  ;;  %3127 = vrot.lane.b32.xlu0 %v3839_v24, %s3480_s4  ;;  %v2536_v26 = vld [vmem:[%s3582_s10 + $0x46] sm:$0xff]  ;;  %v2554_v35 = vld [vmem:[%s3582_s10 + $0xd6] sm:$0xff] }
  0xc1   : > { %v3868_v59 = vsel %vm1588_vm2, %v1564_v30, %v2839_v43  ;;  %v3871_v61 = vsel %vm1588_vm2, %v1565_v32, %v2840_v41  ;;  %v2853_v62 = vpop.permute.xlu1 %2852  ;;  %v253_v30 = vld [vmem:[%s3582_s10 + $0xd0] sm:$0xff]  ;;  %v254_v32 = vld [vmem:[%s3582_s10 + $0xd8] sm:$0xff]  ;;  %v3156_v33 = vpack.i.bf16 %v2537_v27, %v2536_v26  ;;  %v3171_v53 = vpack.i.bf16 %v2555_v36, %v2554_v35 }
  0xc2   : > { %v2855_v34 = vunpack.i.h.bf16 %v2853_v62  ;;  %v2854_v2 = vunpack.i.l.bf16 %v2853_v62  ;;  %v2848_v3 = vpop.permute.xlu0 %2847  ;;  %v2538_v41 = vld [vmem:[%s3582_s10 + $0x56] sm:$0xff]  ;;  %v2539_v43 = vld [vmem:[%s3582_s10 + $0x5e] sm:$0xff]  ;;  %v2427_v27 = vld [vmem:[%s3582_s10 + $0xeb] sm:$0xff]  ;;  %v2810_v35 = vunpack.i.h.bf16 %v3803_v60  ;;  %v2809_v36 = vunpack.i.l.bf16 %v3803_v60 }
  0xc3   : > { %v2850_v10 = vunpack.i.h.bf16 %v2848_v3  ;;  %v2849_v11 = vunpack.i.l.bf16 %v2848_v3  ;;  %3142 = vrot.lane.b32.xlu1 %v3141_v28, %s3481_s9  ;;  %v3166_v62 = vpack.i.bf16 %v2539_v43, %v2538_v41  ;;  %v3181_v3 = vpack.i.bf16 %v2425_v49, %v2424_v44  ;;  %v256_v41 = vld [vmem:[%s3582_s10 + $0xe8] sm:$0xff] }
  0xc4   : > { %v3879_v15 = vsel %vm1588_vm2, %v1570_v1, %v2854_v2  ;;  %v3882_v18 = vsel %vm1588_vm2, %v1571_v8, %v2855_v34  ;;  %3137 = vrot.lane.b32.xlu0 %v3136_v29, %s3481_s9  ;;  %v3161_v29 = vpack.i.bf16 %v2553_v20, %v2552_v19  ;;  %v1582_v34 = vsel %vm1555_vm1, %v253_v30, %v2804_v38  ;;  %v2411_v30 = vld [vmem:[%s3582_s10 + $0x6b] sm:$0xff] }
  0xc5   : > { %v3888_v21 = vsel %vm1588_vm2, %v1568_v12, %v2849_v11  ;;  %v3891_v22 = vsel %vm1588_vm2, %v1569_v14, %v2850_v10  ;;  %v3893_v25 = vpop.permute.xlu1 %2862  ;;  %v1583_v2 = vsel %vm1555_vm1, %v254_v32, %v2805_v37  ;;  %v1581_v1 = vsel %vm1555_vm1, %v252_v58, %v2800_v45  ;;  %v2426_v12 = vld [vmem:[%s3582_s10 + $0xe3] sm:$0xff]  ;;  %v257_v32 = vld [vmem:[%s3582_s10 + $0xf0] sm:$0xff] }
  0xc6   : > { %v3897_v28 = vpop.permute.xlu0 %2857  ;;  %v2815_v14 = vunpack.i.h.bf16 %v3799_v57  ;;  %v2814_v19 = vunpack.i.l.bf16 %v3799_v57  ;;  %v255_v57 = vld [vmem:[%s3582_s10 + $0xe0] sm:$0xff] }
  0xc7   : > { %3152 = vrot.lane.b32.xlu1 %v3151_v5, %s3481_s9  ;;  %v3176_v5 = vpack.i.bf16 %v2409_v52, %v2408_v51  ;;  %v3191_v51 = vpack.i.bf16 %v2427_v27, %v2426_v12  ;;  %v2460_v12 = vld [vmem:[%s3582_s10 + $0xec] sm:$0xff]  ;;  %v2859_v9 = vunpack.i.l.bf16 %v3897_v28 }
  0xc8   : > { %3147 = vrot.lane.b32.xlu0 %v3146_v6, %s3481_s9  ;;  %v1580_v6 = vsel %vm1555_vm1, %v251_v31, %v2799_v46  ;;  %v1586_v31 = vsel %vm1555_vm1, %v257_v32, %v2814_v19  ;;  %v2443_v19 = vld [vmem:[%s3582_s10 + $0x64] sm:$0xff] }
  0xc9   : > { %v3907_v40 = vpop.permute.xlu1 %2872 }
  0xca   : > { %4828 = vst [vmem:[#allocation11_spill] sm:$0xff] %v3907_v40  ;;  %v3914_v48 = vpop.permute.xlu0 %2867  ;;  %v244_v40 = vld [vmem:[%s3582_s10 + $0x88] sm:$0xff] }
  0xcb   : > { %4829 = vst [vmem:[#allocation12_spill] sm:$0xff] %v3914_v48  ;;  %3162 = vrot.lane.b32.xlu1 %v3161_v29, %s3482_s11  ;;  %v2410_v29 = vld [vmem:[%s3582_s10 + $0x63] sm:$0xff]  ;;  %v246_v48 = vld [vmem:[%s3582_s10 + $0x98] sm:$0xff] }
  0xcc   : > { %3157 = vrot.lane.b32.xlu0 %v3156_v33, %s3482_s11  ;;  %v258_v33 = vld [vmem:[%s3582_s10 + $0xf8] sm:$0xff]  ;;  %v3186_v52 = vpack.i.bf16 %v2411_v30, %v2410_v29 }
  0xcd   : > { %v2883_v54 = vpop.permute.xlu1 %2882  ;;  %v1587_v58 = vsel %vm1555_vm1, %v258_v33, %v2815_v14 }
  0xce   : > { %v2885_v8 = vunpack.i.h.bf16 %v2883_v54  ;;  %v2884_v10 = vunpack.i.l.bf16 %v2883_v54  ;;  %v2878_v11 = vpop.permute.xlu0 %2877 }
  0xcf   : > { %v2880_v20 = vunpack.i.h.bf16 %v2878_v11  ;;  %v2879_v26 = vunpack.i.l.bf16 %v2878_v11  ;;  %3172 = vrot.lane.b32.xlu1 %v3171_v53, %s3482_s11  ;;  %v2459_v11 = vld [vmem:[%s3582_s10 + $0xe4] sm:$0xff] }
  0xd0   : > { %v3939_v37 = vsel %vm1588_vm2, %v1582_v34, %v2884_v10  ;;  %v3942_v38 = vsel %vm1588_vm2, %v1583_v2, %v2885_v8  ;;  %3167 = vrot.lane.b32.xlu0 %v3166_v62, %s3482_s11  ;;  %v1584_v34 = vsel %vm1555_vm1, %v255_v57, %v2809_v36  ;;  %v1585_v2 = vsel %vm1555_vm1, %v256_v41, %v2810_v35  ;;  %v2493_v41 = vld [vmem:[%s3582_s10 + $0xfc] sm:$0xff] }
  0xd1   : > { %v3948_v43 = vsel %vm1588_vm2, %v1580_v6, %v2879_v26  ;;  %v3951_v44 = vsel %vm1588_vm2, %v1581_v1, %v2880_v20  ;;  %v2893_v45 = vpop.permute.xlu1 %2892  ;;  %v3211_v26 = vpack.i.bf16 %v2460_v12, %v2459_v11 }
  0xd2   : > { %v2895_v46 = vunpack.i.h.bf16 %v2893_v45  ;;  %v2894_v49 = vunpack.i.l.bf16 %v2893_v45  ;;  %v2888_v60 = vpop.permute.xlu0 %2887 }
  0xd3   : > { %v2890_v53 = vunpack.i.h.bf16 %v2888_v60  ;;  %v2889_v62 = vunpack.i.l.bf16 %v2888_v60  ;;  %3182 = vrot.lane.b32.xlu1 %v3181_v3, %s3478_s24  ;;  %v2477_v60 = vld [vmem:[%s3582_s10 + $0x7c] sm:$0xff] }
  0xd4   : > { %v3959_v54 = vsel %vm1588_vm2, %v1586_v31, %v2894_v49  ;;  %v3962_v6 = vsel %vm1588_vm2, %v1587_v58, %v2895_v46  ;;  %3177 = vrot.lane.b32.xlu0 %v3176_v5, %s3478_s24  ;;  %v2444_v5 = vld [vmem:[%s3582_s10 + $0x6c] sm:$0xff]  ;;  %v2476_v49 = vld [vmem:[%s3582_s10 + $0x74] sm:$0xff] }
  0xd5   : > { %v3966_v1 = vsel %vm1588_vm2, %v1584_v34, %v2889_v62  ;;  %v3969_v8 = vsel %vm1588_vm2, %v1585_v2, %v2890_v53  ;;  %v3971_v3 = vpop.permute.xlu1 %2902  ;;  %v3206_v27 = vpack.i.bf16 %v2444_v5, %v2443_v19  ;;  %v4023_v62 = vpack.i.bf16 %v2477_v60, %v2476_v49  ;;  %v2523_v34 = vld [vmem:[%s3582_s10 + $0xe5] sm:$0xff]  ;;  %v2524_v2 = vld [vmem:[%s3582_s10 + $0xed] sm:$0xff] }
  0xd6   : > { %v3973_v10 = vpop.permute.xlu0 %2897  ;;  %v2508_v19 = vld [vmem:[%s3582_s10 + $0x6d] sm:$0xff] }
  0xd7   : > { %3192 = vrot.lane.b32.xlu1 %v3191_v51, %s3478_s24  ;;  %v2540_v49 = vld [vmem:[%s3582_s10 + $0x66] sm:$0xff]  ;;  %v2541_v60 = vld [vmem:[%s3582_s10 + $0x6e] sm:$0xff]  ;;  %v2899_v13 = vunpack.i.l.bf16 %v3973_v10 }
  0xd8   : > { %3187 = vrot.lane.b32.xlu0 %v3186_v52, %s3478_s24 }
  0xd9   : > { %v3979_v14 = vpop.permute.xlu1 %2912 }
  0xda   : > { %4830 = vst [vmem:[#allocation13_spill] sm:$0xff] %v3979_v14  ;;  %v3983_v20 = vpop.permute.xlu0 %2907  ;;  %v2785_v14 = vunpack.i.h.bf16 %v3773_v39 }
  0xdb   : > { %4831 = vst [vmem:[#allocation14_spill] sm:$0xff] %v3983_v20  ;;  %3202 = vrot.lane.b32.xlu1 %v3836_v23, %s3479_s27 }
  0xdc   : > { %3197 = vrot.lane.b32.xlu0 %v3839_v24, %s3479_s27  ;;  %v2492_v24 = vld [vmem:[%s3582_s10 + $0xf4] sm:$0xff] }
  0xdd   : > { %v2923_v29 = vpop.permute.xlu1 %2922 }
  0xde   : > { %v2925_v30 = vunpack.i.h.bf16 %v2923_v29  ;;  %v2924_v32 = vunpack.i.l.bf16 %v2923_v29  ;;  %v2918_v33 = vpop.permute.xlu0 %2917 }
  0xdf   : > { %v2920_v35 = vunpack.i.h.bf16 %v2918_v33  ;;  %v2919_v36 = vunpack.i.l.bf16 %v2918_v33  ;;  %3212 = vrot.lane.b32.xlu1 %v3211_v26, %s3479_s27 }
  0xe0   : > { %v3992_v23 = vsel %vm1621_vm3, %v3858_v55, %v2924_v32  ;;  %v3996_v57 = vsel %vm1621_vm3, %v3861_v56, %v2925_v30  ;;  %3207 = vrot.lane.b32.xlu0 %v3206_v27, %s3479_s27  ;;  %v2509_v30 = vld [vmem:[%s3582_s10 + $0x75] sm:$0xff]  ;;  %v2510_v32 = vld [vmem:[%s3582_s10 + $0x7d] sm:$0xff] }
  0xe1   : > { %4832 = vst [vmem:[#allocation15_spill] sm:$0xff] %v3992_v23  ;;  %4833 = vst [vmem:[#allocation16_spill] sm:$0xff] %v3996_v57  ;;  %v4003_v45 = vsel %vm1621_vm3, %v3868_v59, %v2919_v36  ;;  %v4007_v46 = vsel %vm1621_vm3, %v3871_v61, %v2920_v35  ;;  %v2933_v55 = vpop.permute.xlu1 %2932  ;;  %v4012_v59 = vpack.i.bf16 %v2493_v41, %v2492_v24  ;;  %v2556_v24 = vld [vmem:[%s3582_s10 + $0xe6] sm:$0xff]  ;;  %v2557_v41 = vld [vmem:[%s3582_s10 + $0xee] sm:$0xff]  ;;  %v2740_v57 = vunpack.i.h.bf16 %v3727_v7 }
  0xe2   : > { %4834 = vst [vmem:[#allocation17_spill] sm:$0xff] %v4003_v45  ;;  %4835 = vst [vmem:[#allocation18_spill] sm:$0xff] %v4007_v46  ;;  %v2935_v51 = vunpack.i.h.bf16 %v2933_v55  ;;  %v2934_v56 = vunpack.i.l.bf16 %v2933_v55  ;;  %v2928_v52 = vpop.permute.xlu0 %2927  ;;  %v3246_v36 = vpack.i.bf16 %v2510_v32, %v2509_v30  ;;  %v2542_v30 = vld [vmem:[%s3582_s10 + $0x76] sm:$0xff]  ;;  %v2543_v32 = vld [vmem:[%s3582_s10 + $0x7e] sm:$0xff]  ;;  %v2739_v23 = vunpack.i.l.bf16 %v3727_v7 }
  0xe3   : > { %v2930_v31 = vunpack.i.h.bf16 %v2928_v52  ;;  %v2929_v58 = vunpack.i.l.bf16 %v2928_v52  ;;  %3222 = vrot.lane.b32.xlu1 %v3211_v26, %s3480_s4  ;;  %v3241_v26 = vpack.i.bf16 %v2524_v2, %v2523_v34  ;;  %v3261_v34 = vpack.i.bf16 %v2557_v41, %v2556_v24 }
  0xe4   : > { %v4016_v53 = vsel %vm1621_vm3, %v3879_v15, %v2934_v56  ;;  %v4020_v61 = vsel %vm1621_vm3, %v3882_v18, %v2935_v51  ;;  %3217 = vrot.lane.b32.xlu0 %v3206_v27, %s3480_s4  ;;  %v2507_v18 = vld [vmem:[%s3582_s10 + $0x65] sm:$0xff]  ;;  %v2526_v27 = vld [vmem:[%s3582_s10 + $0xfd] sm:$0xff]  ;;  %v2784_v45 = vunpack.i.l.bf16 %v3773_v39  ;;  %v2905_v39 = vunpack.i.h.bf16 %v3971_v3 }
  0xe5   : > { %4836 = vst [vmem:[#allocation19_spill] sm:$0xff] %v4016_v53  ;;  %4837 = vst [vmem:[#allocation20_spill] sm:$0xff] %v4020_v61  ;;  %v4029_v11 = vsel %vm1621_vm3, %v3888_v21, %v2929_v58  ;;  %v4033_v15 = vsel %vm1621_vm3, %v3891_v22, %v2930_v31  ;;  %v4035_v12 = vpop.permute.xlu1 %2942  ;;  %v3236_v21 = vpack.i.bf16 %v2508_v19, %v2507_v18  ;;  %v2525_v22 = vld [vmem:[%s3582_s10 + $0xf5] sm:$0xff] }
  0xe6   : > { %4838 = vst [vmem:[#allocation21_spill] sm:$0xff] %v4029_v11  ;;  %4839 = vst [vmem:[#allocation22_spill] sm:$0xff] %v4033_v15  ;;  %v4039_v5 = vpop.permute.xlu0 %2937  ;;  %v3251_v35 = vpack.i.bf16 %v2526_v27, %v2525_v22  ;;  %v3256_v19 = vpack.i.bf16 %v2541_v60, %v2540_v49  ;;  %v3266_v49 = vpack.i.bf16 %v2543_v32, %v2542_v30  ;;  %v2428_v60 = vld [vmem:[%s3582_s10 + $0xf3] sm:$0xff]  ;;  %v2415_v30 = vld [vmem:[%s3582_s10 + $0x8b] sm:$0xff]  ;;  %v2909_v32 = vunpack.i.l.bf16 %v3983_v20 }
  0xe7   : > { %3232 = vrot.lane.b32.xlu1 %v4012_v59, %s3480_s4  ;;  %v4228_v20 = vld [vmem:[%s3582_s10 + $0x9e] sm:$0xff] }
  0xe8   : > { %3227 = vrot.lane.b32.xlu0 %v4023_v62, %s3480_s4 }
  0xe9   : > { %v4047_v29 = vpop.permute.xlu1 %2952 }
  0xea   : > { %4840 = vst [vmem:[#allocation23_spill] sm:$0xff] %v4047_v29  ;;  %v4051_v33 = vpop.permute.xlu0 %2947  ;;  %v4225_v29 = vld [vmem:[%s3582_s10 + $0x96] sm:$0xff] }
  0xeb   : > { %4841 = vst [vmem:[#allocation24_spill] sm:$0xff] %v4051_v33  ;;  %3242 = vrot.lane.b32.xlu1 %v3241_v26, %s3481_s9  ;;  %v2558_v26 = vld [vmem:[%s3582_s10 + $0xf6] sm:$0xff] }
  0xec   : > { %3237 = vrot.lane.b32.xlu0 %v3236_v21, %s3481_s9  ;;  %v2559_v21 = vld [vmem:[%s3582_s10 + $0xfe] sm:$0xff] }
  0xed   : > { %v2963_v55 = vpop.permute.xlu1 %2962 }
  0xee   : > { %v2965_v51 = vunpack.i.h.bf16 %v2963_v55  ;;  %v2964_v56 = vunpack.i.l.bf16 %v2963_v55  ;;  %v2958_v52 = vpop.permute.xlu0 %2957 }
  0xef   : > { %v2960_v31 = vunpack.i.h.bf16 %v2958_v52  ;;  %v2959_v58 = vunpack.i.l.bf16 %v2958_v52  ;;  %3252 = vrot.lane.b32.xlu1 %v3251_v35, %s3481_s9 }
  0xf0   : > { %v4062_v2 = vsel %vm1621_vm3, %v3939_v37, %v2964_v56  ;;  %v4066_v18 = vsel %vm1621_vm3, %v3942_v38, %v2965_v51  ;;  %3247 = vrot.lane.b32.xlu0 %v3246_v36, %s3481_s9  ;;  %v2429_v51 = vld [vmem:[%s3582_s10 + $0xfb] sm:$0xff] }
  0xf1   : > { %4842 = vst [vmem:[#allocation25_spill] sm:$0xff] %v4062_v2  ;;  %4843 = vst [vmem:[#allocation26_spill] sm:$0xff] %v4066_v18  ;;  %v4073_v22 = vsel %vm1621_vm3, %v3948_v43, %v2959_v58  ;;  %v4077_v27 = vsel %vm1621_vm3, %v3951_v44, %v2960_v31  ;;  %v2973_v37 = vpop.permute.xlu1 %2972  ;;  %v3271_v43 = vpack.i.bf16 %v2559_v21, %v2558_v26  ;;  %v2413_v31 = vld [vmem:[%s3582_s10 + $0x7b] sm:$0xff]  ;;  %v2749_v58 = vunpack.i.l.bf16 %v3723_v4  ;;  %v2431_v21 = vld [vmem:[%s3582_s10 + $0x10b] sm:$0xff] }
  0xf2   : > { %4844 = vst [vmem:[#allocation27_spill] sm:$0xff] %v4073_v22  ;;  %4845 = vst [vmem:[#allocation28_spill] sm:$0xff] %v4077_v27  ;;  %v2975_v38 = vunpack.i.h.bf16 %v2973_v37  ;;  %v2974_v35 = vunpack.i.l.bf16 %v2973_v37  ;;  %v2968_v36 = vpop.permute.xlu0 %2967  ;;  %v2829_v26 = vunpack.i.l.bf16 %v3828_v17  ;;  %v2414_v37 = vld [vmem:[%s3582_s10 + $0x83] sm:$0xff]  ;;  %v4208_v22 = vld [vmem:[%s3582_s10 + $0x8e] sm:$0xff] }
  0xf3   : > { %v2970_v24 = vunpack.i.h.bf16 %v2968_v36  ;;  %v2969_v41 = vunpack.i.l.bf16 %v2968_v36  ;;  %3262 = vrot.lane.b32.xlu1 %v3261_v34, %s3482_s11  ;;  %v231_v34 = vld [vmem:[%s3582_s10 + $0x20] sm:$0xff]  ;;  %v2464_v36 = vld [vmem:[%s3582_s10 + $0x10c] sm:$0xff] }
  0xf4   : > { %v4084_v44 = vsel %vm1621_vm3, %v3959_v54, %v2974_v35  ;;  %v4088_v55 = vsel %vm1621_vm3, %v3962_v6, %v2975_v38  ;;  %3257 = vrot.lane.b32.xlu0 %v3256_v19, %s3482_s11  ;;  %v2412_v6 = vld [vmem:[%s3582_s10 + $0x73] sm:$0xff]  ;;  %v2463_v35 = vld [vmem:[%s3582_s10 + $0x104] sm:$0xff]  ;;  %v1560_v61 = vsel %vm1555_vm1, %v231_v34, %v2749_v58 }
  0xf5   : > { %4846 = vst [vmem:[#allocation29_spill] sm:$0xff] %v4084_v44  ;;  %4847 = vst [vmem:[#allocation30_spill] sm:$0xff] %v4088_v55  ;;  %v4095_v56 = vsel %vm1621_vm3, %v3966_v1, %v2969_v41  ;;  %v4099_v54 = vsel %vm1621_vm3, %v3969_v8, %v2970_v24  ;;  %v4101_v52 = vpop.permute.xlu1 %2982  ;;  %v2430_v1 = vld [vmem:[%s3582_s10 + $0x103] sm:$0xff]  ;;  %v3281_v8 = vpack.i.bf16 %v2429_v51, %v2428_v60  ;;  %v4124_v60 = vld [vmem:[%s3582_s10 + $0x114] sm:$0xff] }
  0xf6   : > { %4848 = vst [vmem:[#allocation31_spill] sm:$0xff] %v4095_v56  ;;  %4849 = vst [vmem:[#allocation32_spill] sm:$0xff] %v4099_v54  ;;  %v4107_v19 = vpop.permute.xlu0 %2977  ;;  %v3276_v38 = vpack.i.bf16 %v2413_v31, %v2412_v6  ;;  %v2447_v24 = vld [vmem:[%s3582_s10 + $0x84] sm:$0xff]  ;;  %v4127_v51 = vld [vmem:[%s3582_s10 + $0x11c] sm:$0xff]  ;;  %v1593_v15 = vsel %vm1588_vm2, %v1560_v61, %v2829_v26  ;;  %v3291_v58 = vpack.i.bf16 %v2431_v21, %v2430_v1 }
  0xf7   : > { %3272 = vrot.lane.b32.xlu1 %v3271_v43, %s3482_s11  ;;  %v2448_v43 = vld [vmem:[%s3582_s10 + $0x8c] sm:$0xff]  ;;  %v4133_v55 = vld [vmem:[%s3582_s10 + $0x94] sm:$0xff]  ;;  %v227_v31 = vld [vmem:[%s3582_s10] sm:$0xff]  ;;  %v1626_v61 = vsel %vm1621_vm3, %v1593_v15, %v2909_v32  ;;  %v3286_v1 = vpack.i.bf16 %v2415_v30, %v2414_v37  ;;  %v4173_v7 = vpack.i.bf16 %v2464_v36, %v2463_v35  ;;  %v2745_v32 = vunpack.i.h.bf16 %v3743_v16 }
  0xf8   : > { %3267 = vrot.lane.b32.xlu0 %v3266_v49, %s3482_s11  ;;  %v4136_v49 = vld [vmem:[%s3582_s10 + $0x9c] sm:$0xff]  ;;  %v4139_v6 = vld [vmem:[%s3582_s10 + $0x105] sm:$0xff]  ;;  %v4147_v34 = vld [vmem:[%s3582_s10 + $0x10d] sm:$0xff]  ;;  %v4175_v46 = vpack.i.bf16 %v2448_v43, %v2447_v24  ;;  %v1556_v33 = vsel %vm1555_vm1, %v227_v31, %v2739_v23  ;;  %v2780_v23 = vunpack.i.h.bf16 %v3777_v42 }
  0xf9   : > { %v4120_v41 = vpop.permute.xlu1 %2992  ;;  %v228_v44 = vld [vmem:[%s3582_s10 + $0x8] sm:$0xff]  ;;  %v4160_v26 = vld [vmem:[%s3582_s10 + $0x115] sm:$0xff]  ;;  %v4178_v15 = vld [vmem:[%s3582_s10 + $0x9d] sm:$0xff] }
  0xfa   : > { %v4130_v53 = vpop.permute.xlu0 %2987  ;;  %v4150_v54 = vld [vmem:[%s3582_s10 + $0x85] sm:$0xff]  ;;  %v4153_v56 = vld [vmem:[%s3582_s10 + $0x8d] sm:$0xff]  ;;  %v4166_v21 = vld [vmem:[%s3582_s10 + $0x95] sm:$0xff] }
  0xfb   : > { %v2989_v11 = vunpack.i.l.bf16 %v4130_v53  ;;  %3282 = vrot.lane.b32.xlu1 %v3281_v8, %s3478_s24  ;;  %v4163_v8 = vld [vmem:[%s3582_s10 + $0x11d] sm:$0xff]  ;;  %v4181_v37 = vld [vmem:[%s3582_s10 + $0x106] sm:$0xff]  ;;  %v4184_v30 = vld [vmem:[%s3582_s10 + $0x10e] sm:$0xff] }
  0xfc   : > { %3277 = vrot.lane.b32.xlu0 %v3276_v38, %s3478_s24  ;;  %v229_v38 = vld [vmem:[%s3582_s10 + $0x10] sm:$0xff]  ;;  %v4197_v43 = vld [vmem:[%s3582_s10 + $0x86] sm:$0xff] }
  0xfd   : > { %v4169_v18 = vsel %vm1654_vm4, %v1626_v61, %v2989_v11  ;;  %v4171_v2 = vpop.permute.xlu1 %3002  ;;  %v2744_v11 = vunpack.i.l.bf16 %v3743_v16  ;;  %v230_v61 = vld [vmem:[%s3582_s10 + $0x18] sm:$0xff]  ;;  %v245_v16 = vld [vmem:[%s3582_s10 + $0x90] sm:$0xff]  ;;  %v243_v36 = vld [vmem:[%s3582_s10 + $0x80] sm:$0xff] }
  0xfe   : > { %4850 = vst [vmem:[#allocation33_spill] sm:$0xff] %v4169_v18  ;;  %v4190_v35 = vpop.permute.xlu0 %2997  ;;  %v4211_v24 = vld [vmem:[%s3582_s10 + $0x116] sm:$0xff]  ;;  %v4214_v18 = vld [vmem:[%s3582_s10 + $0x11e] sm:$0xff]  ;;  %v1559_v27 = vsel %vm1555_vm1, %v230_v61, %v2745_v32  ;;  %v2864_v61 = vunpack.i.l.bf16 %v3893_v25 }
  0xff   : > { %3292 = vrot.lane.b32.xlu1 %v3291_v58, %s3478_s24  ;;  %v1557_v58 = vsel %vm1555_vm1, %v228_v44, %v2740_v57  ;;  %v2779_v57 = vunpack.i.l.bf16 %v3777_v42  ;;  %v2824_v44 = vunpack.i.l.bf16 %v3809_v63  ;;  %v1574_v42 = vsel %vm1555_vm1, %v245_v16, %v2784_v45 }
 0x100   : > { %3287 = vrot.lane.b32.xlu0 %v3286_v1, %s3478_s24  ;;  %v1558_v1 = vsel %vm1555_vm1, %v229_v38, %v2744_v11  ;;  %v2820_v11 = vunpack.i.h.bf16 %v3811_v0  ;;  %v2865_v38 = vunpack.i.h.bf16 %v3893_v25  ;;  %v1575_v63 = vsel %vm1555_vm1, %v246_v48, %v2785_v14  ;;  %s3383_s24 = sshll.u32 %s3483_s21, 4  ;;  %s3384_s24 = int_to_ptr.vmem [resolvable:$false] %s3383_s24 }
 0x101   : > { %v4234_v31 = vpop.permute.xlu1 %3012  ;;  %v1572_v45 = vsel %vm1555_vm1, %v243_v36, %v2779_v57  ;;  %v1591_v16 = vsel %vm1588_vm2, %v1558_v1, %v2824_v44  ;;  %v2860_v0 = vunpack.i.h.bf16 %v3897_v28  ;;  %v2904_v25 = vunpack.i.l.bf16 %v3971_v3 }
 0x102   : > { %v4241_v17 = vpop.permute.xlu0 %3007  ;;  %v1592_v48 = vsel %vm1588_vm2, %v1559_v27, %v2825_v50  ;;  %v1589_v14 = vsel %vm1588_vm2, %v1556_v33, %v2819_v47  ;;  %v1590_v28 = vsel %vm1588_vm2, %v1557_v58, %v2820_v11  ;;  %v1607_v3 = vsel %vm1588_vm2, %v1574_v42, %v2864_v61 }
 0x103   : > { %3302 = vrot.lane.b32.xlu1 %v4012_v59, %s3479_s27  ;;  %v1573_v59 = vsel %vm1555_vm1, %v244_v40, %v2780_v23  ;;  %v2900_v40 = vunpack.i.h.bf16 %v3973_v10  ;;  %v1608_v36 = vsel %vm1588_vm2, %v1575_v63, %v2865_v38  ;;  %v1605_v23 = vsel %vm1588_vm2, %v1572_v45, %v2859_v9 }
 0x104   : > { %3297 = vrot.lane.b32.xlu0 %v4023_v62, %s3479_s27  ;;  %v2944_v62 = vunpack.i.l.bf16 %v4035_v12  ;;  %v2945_v47 = vunpack.i.h.bf16 %v4035_v12  ;;  %v2940_v50 = vunpack.i.h.bf16 %v4039_v5  ;;  %v2939_v10 = vunpack.i.l.bf16 %v4039_v5 }
 0x105   : > { %v4264_v32 = vpop.permute.xlu1 %3022  ;;  %v2984_v33 = vunpack.i.l.bf16 %v4101_v52  ;;  %v1606_v58 = vsel %vm1588_vm2, %v1573_v59, %v2860_v0  ;;  %v1624_v57 = vsel %vm1621_vm3, %v1591_v16, %v2904_v25  ;;  %v1625_v44 = vsel %vm1621_vm3, %v1592_v48, %v2905_v39 }
 0x106   : > { %v4270_v4 = vpop.permute.xlu0 %3017  ;;  %v1622_v9 = vsel %vm1621_vm3, %v1589_v14, %v2899_v13  ;;  %v1623_v12 = vsel %vm1621_vm3, %v1590_v28, %v2900_v40  ;;  %v1640_v42 = vsel %vm1621_vm3, %v1607_v3, %v2944_v62  ;;  %v2985_v5 = vunpack.i.h.bf16 %v4101_v52 }
 0x107   : > { %3312 = vrot.lane.b32.xlu1 %v4173_v7, %s3479_s27  ;;  %v2979_v11 = vunpack.i.l.bf16 %v4107_v19  ;;  %v2980_v38 = vunpack.i.h.bf16 %v4107_v19  ;;  %v2995_v39 = vunpack.i.h.bf16 %v4120_v41  ;;  %v2994_v13 = vunpack.i.l.bf16 %v4120_v41 }
 0x108   : > { %3307 = vrot.lane.b32.xlu0 %v4175_v46, %s3479_s27  ;;  %v2990_v61 = vunpack.i.h.bf16 %v4130_v53  ;;  %v4309_v63 = vsel %vm1621_vm3, %v1608_v36, %v2945_v47  ;;  %v1638_v52 = vsel %vm1621_vm3, %v1605_v23, %v2939_v10  ;;  %v1639_v45 = vsel %vm1621_vm3, %v1606_v58, %v2940_v50 }
 0x109   : > { %v4288_v27 = vpop.permute.xlu1 %3032  ;;  %v3005_v59 = vunpack.i.h.bf16 %v4171_v2  ;;  %v3004_v41 = vunpack.i.l.bf16 %v4171_v2  ;;  %v3015_v53 = vunpack.i.h.bf16 %v4234_v31  ;;  %v1658_v0 = vsel %vm1654_vm4, %v1625_v44, %v2985_v5 }
 0x10a   : > { %v4294_v1 = vpop.permute.xlu0 %3027  ;;  %v1655_v25 = vsel %vm1654_vm4, %v1622_v9, %v2979_v11  ;;  %v3010_v48 = vunpack.i.h.bf16 %v4241_v17  ;;  %v3009_v14 = vunpack.i.l.bf16 %v4241_v17  ;;  %v4851_v40 = vpack.i.bf16 %v4127_v51, %v4124_v60 }
 0x10b   : > { %3322 = vrot.lane.b32.xlu1 %v4173_v7, %s3480_s4  ;;  %v1657_v7 = vsel %vm1654_vm4, %v1624_v57, %v2984_v33  ;;  %v1656_v2 = vsel %vm1654_vm4, %v1623_v12, %v2980_v38  ;;  %v1672_v62 = vsel %vm1654_vm4, %v1639_v45, %v2994_v13  ;;  %v1671_v28 = vsel %vm1654_vm4, %v1638_v52, %v2990_v61 }
 0x10c   : > { %3317 = vrot.lane.b32.xlu0 %v4175_v46, %s3480_s4  ;;  %v3014_v46 = vunpack.i.l.bf16 %v4234_v31  ;;  %v4331_v31 = vsel %vm1654_vm4, %v1640_v42, %v2995_v39  ;;  %v4852_v3 = vpack.i.bf16 %v4136_v49, %v4133_v55  ;;  %v2999_v17 = vunpack.i.l.bf16 %v4190_v35 }
 0x10d   : > { %v3043_v19 = vpop.permute.xlu1 %3042  ;;  %v3025_v60 = vunpack.i.h.bf16 %v4264_v32  ;;  %v3024_v51 = vunpack.i.l.bf16 %v4264_v32  ;;  %v3034_v36 = vunpack.i.l.bf16 %v4288_v27  ;;  %v1688_v47 = vsel %vm1687_vm5, %v1655_v25, %v3004_v41 }
 0x10e   : > { %v4318_v16 = vpop.permute.xlu0 %3037  ;;  %v1689_v50 = vsel %vm1687_vm5, %v1656_v2, %v3005_v59  ;;  %v1690_v10 = vsel %vm1687_vm5, %v1657_v7, %v3014_v46  ;;  %v1691_v33 = vsel %vm1687_vm5, %v1658_v0, %v3015_v53  ;;  %v1704_v49 = vsel %vm1687_vm5, %v1671_v28, %v3009_v14 }
 0x10f   : > { %3332 = vrot.lane.b32.xlu1 %v4851_v40, %s3480_s4  ;;  %v1705_v58 = vsel %vm1687_vm5, %v1672_v62, %v3010_v48  ;;  %v3045_v57 = vunpack.i.h.bf16 %v3043_v19  ;;  %v3044_v44 = vunpack.i.l.bf16 %v3043_v19  ;;  %v4853_v32 = vpack.i.bf16 %v4147_v34, %v4139_v6 }
 0x110   : > { %3327 = vrot.lane.b32.xlu0 %v4852_v3, %s3480_s4  ;;  %v3020_v9 = vunpack.i.h.bf16 %v4270_v4  ;;  %v3019_v12 = vunpack.i.l.bf16 %v4270_v4  ;;  %v3035_v42 = vunpack.i.h.bf16 %v4288_v27  ;;  %v3029_v5 = vunpack.i.l.bf16 %v4294_v1  ;;  %s2586_s4 = sshll.u32 %s3461_s16, 6 }
 0x111   : > { %v3053_v23 = vpop.permute.xlu1 %3052  ;;  %v4854_v11 = vpack.i.bf16 %v4153_v56, %v4150_v54  ;;  %v1721_v38 = vsel %vm1720_vm6, %v1688_v47, %v3024_v51  ;;  %v1722_v39 = vsel %vm1720_vm6, %v1689_v50, %v3025_v60  ;;  %v1723_v6 = vsel %vm1720_vm6, %v1690_v10, %v3034_v36  ;;  %s4722_s5 = sadd.s32 %s2586_s4, %s2585_s29 }
 0x112   : > { %v3048_v55 = vpop.permute.xlu0 %3047  ;;  %v3030_v34 = vunpack.i.h.bf16 %v4294_v1  ;;  %v3055_v61 = vunpack.i.h.bf16 %v3053_v23  ;;  %v3054_v4 = vunpack.i.l.bf16 %v3053_v23  ;;  %v4855_v56 = vpack.i.bf16 %v4163_v8, %v4160_v26  ;;  %s2587_s15 = sshll.u32 %s4722_s5, 7 }
 0x113   : > { %3342 = vrot.lane.b32.xlu1 %v4853_v32, %s3481_s9  ;;  %v3050_v7 = vunpack.i.h.bf16 %v3048_v55  ;;  %v3049_v19 = vunpack.i.l.bf16 %v3048_v55  ;;  %v1754_v54 = vsel %vm1753_vm7, %v1721_v38, %v3044_v44  ;;  %v1755_v59 = vsel %vm1753_vm7, %v1722_v39, %v3045_v57  ;;  %s4740_s8 = scalar_lea.hbm %s4807_s3, %s2587_s15 }
 0x114   : > { %3337 = vrot.lane.b32.xlu0 %v4854_v11, %s3481_s9  ;;  %v1724_v41 = vsel %vm1720_vm6, %v1691_v33, %v3035_v42  ;;  %v1737_v1 = vsel %vm1720_vm6, %v1704_v49, %v3029_v5  ;;  %v4856_v53 = vpack.i.bf16 %v4178_v15, %v4166_v21  ;;  %v1738_v26 = vsel %vm1720_vm6, %v1705_v58, %v3030_v34 }
 0x115   : > { %v3063_v13 = vpop.permute.xlu1 %3062  ;;  %v3040_v8 = vunpack.i.h.bf16 %v4318_v16  ;;  %v3039_v25 = vunpack.i.l.bf16 %v4318_v16  ;;  %v1756_v40 = vsel %vm1753_vm7, %v1723_v6, %v3054_v4  ;;  %v1757_v2 = vsel %vm1753_vm7, %v1724_v41, %v3055_v61  ;;  %v4862_v6 = vld [vmem:[#allocation6_spill] sm:$0xff]  ;;  %v232_v61 = vld [vmem:[%s3582_s10 + $0x28] sm:$0xff] }
 0x116   : > { %v3065_v52 = vunpack.i.h.bf16 %v3063_v13  ;;  %v3064_v27 = vunpack.i.l.bf16 %v3063_v13  ;;  %v3058_v45 = vpop.permute.xlu0 %3057  ;;  %v4857_v60 = vpack.i.bf16 %v4184_v30, %v4181_v37  ;;  %v1770_v16 = vsel %vm1753_vm7, %v1737_v1, %v3049_v19  ;;  %v250_v41 = vld [vmem:[%s3582_s10 + $0xb8] sm:$0xff] }
 0x117   : > { %3352 = vrot.lane.b32.xlu1 %v4855_v56, %s3481_s9  ;;  %v1771_v51 = vsel %vm1753_vm7, %v1738_v26, %v3050_v7  ;;  %v3060_v36 = vunpack.i.h.bf16 %v3058_v45  ;;  %v3059_v23 = vunpack.i.l.bf16 %v3058_v45  ;;  %v4858_v10 = vpack.i.bf16 %v4208_v22, %v4197_v43  ;;  %v4863_v45 = vld [vmem:[#allocation7_spill] sm:$0xff]  ;;  %v4864_v56 = vld [vmem:[#allocation8_spill] sm:$0xff] }
 0x118   : > { %3347 = vrot.lane.b32.xlu0 %v4856_v53, %s3481_s9  ;;  %v1787_v46 = vsel %vm1786_vm8, %v1754_v54, %v3064_v27  ;;  %v1788_v0 = vsel %vm1786_vm8, %v1755_v59, %v3065_v52  ;;  %v1674_v37 = vsel %vm1654_vm4, %v4309_v63, %v2999_v17  ;;  %v1706_v58 = vsel %vm1687_vm5, %v4331_v31, %v3019_v12  ;;  %v233_v52 = vld [vmem:[%s3582_s10 + $0x30] sm:$0xff]  ;;  %v234_v27 = vld [vmem:[%s3582_s10 + $0x38] sm:$0xff]  ;;  %v247_v53 = vld [vmem:[%s3582_s10 + $0xa0] sm:$0xff] }
 0x119   : > { %v3073_v48 = vpop.permute.xlu1 %3072  ;;  %v1819_v14 = vpack.c.bf16 %v1788_v0, %v1787_v46  ;;  %v1707_v57 = vsel %vm1687_vm5, %v1674_v37, %v3020_v9  ;;  %v1739_v22 = vsel %vm1720_vm6, %v1706_v58, %v3039_v25  ;;  %v4859_v17 = vpack.i.bf16 %v4214_v18, %v4211_v24  ;;  %v249_v59 = vld [vmem:[%s3582_s10 + $0xb0] sm:$0xff]  ;;  %v248_v26 = vld [vmem:[%s3582_s10 + $0xa8] sm:$0xff]  ;;  %v4866_v25 = vld [vmem:[#allocation10_spill] sm:$0xff]  ;;  %s208_s10 = sand.u32 1, %s3449_s13  }
 0x11a   : > { %v3075_v62 = vunpack.i.h.bf16 %v3073_v48  ;;  %v3074_v28 = vunpack.i.l.bf16 %v3073_v48  ;;  %v3068_v21 = vpop.permute.xlu0 %3067  ;;  %v1740_v43 = vsel %vm1720_vm6, %v1707_v57, %v3040_v8  ;;  %v1772_v31 = vsel %vm1753_vm7, %v1739_v22, %v3059_v23  ;;  %v4865_v46 = vld [vmem:[#allocation9_spill] sm:$0xff]  ;;  %s2297_s27 = sshll.u32 %s208_s10, 8  ;;  %s4751_s9 = scalar_lea.sflag [#allocation3], %s208_s10 }
 0x11b   : > { %v3070_v15 = vunpack.i.h.bf16 %v3068_v21  ;;  %v3069_v3 = vunpack.i.l.bf16 %v3068_v21  ;;  %3362 = vrot.lane.b32.xlu1 %v4857_v60, %s3482_s11  ;;  %2615 = vmatprep.mubr.msk.bf16.mxu0 %vm1862_vm9, %v1819_v14  ;;  %v1773_v9 = vsel %vm1753_vm7, %v1740_v43, %v3060_v36  ;;  %v4860_v12 = vpack.i.bf16 %v4228_v20, %v4225_v29  ;;  %v4861_v20 = vld [vmem:[#allocation5_spill] sm:$0xff]  ;;  %v4867_v14 = vld [vmem:[#allocation11_spill] sm:$0xff]  ;;  %s4674_s28 = scalar_lea.vmem [#allocation2], %s2297_s27  ;;  %s3385_s27 = scalar_lea.vmem %s3384_s24, 8192 }
 0x11c   : > { %v1789_v47 = vsel %vm1786_vm8, %v1756_v40, %v3074_v28  ;;  %v1790_v50 = vsel %vm1786_vm8, %v1757_v2, %v3075_v62  ;;  %3357 = vrot.lane.b32.xlu0 %v4858_v10, %s3482_s11  ;;  %v2750_v29 = vunpack.i.h.bf16 %v4861_v20  ;;  %v2754_v34 = vunpack.i.l.bf16 %v4862_v6  ;;  %v4869_v37 = vld [vmem:[#allocation13_spill] sm:$0xff]  ;;  %s2157_s16 = sshll.u32 %s4674_s28, 4  ;;  %s4744_s16 = int_to_ptr.vmem [resolvable:$true] %s2157_s16 }
 0x11d   : > { %v1820_v30 = vpack.c.bf16 %v1790_v50, %v1789_v47  ;;  %v4398_v33 = vpop.permute.xlu1 %3082  ;;  %v1803_v55 = vsel %vm1786_vm8, %v1770_v16, %v3069_v3  ;;  %v1804_v49 = vsel %vm1786_vm8, %v1771_v51, %v3070_v15  ;;  %v2755_v4 = vunpack.i.h.bf16 %v4862_v6  ;;  %v4868_v15 = vld [vmem:[#allocation12_spill] sm:$0xff]  ;;  %p3386_p2 = scmp.lt.s32.totalorder %s4744_s16, %s3384_s24 }
 0x11e   : > { %v3078_v44 = vpop.permute.xlu0 %3077  ;;  %v1827_v32 = vpack.c.bf16 %v1804_v49, %v1803_v55  ;;  %v2795_v7 = vunpack.i.h.bf16 %v4863_v45  ;;  %v2794_v19 = vunpack.i.l.bf16 %v4863_v45  ;;  %v2789_v54 = vunpack.i.l.bf16 %v4864_v56 }
 0x11f   : > { %v3080_v42 = vunpack.i.h.bf16 %v3078_v44  ;;  %v3079_v63 = vunpack.i.l.bf16 %v3078_v44  ;;  %3372 = vrot.lane.b32.xlu1 %v4859_v17, %s3482_s11  ;;  %2616 = vmatmul.mubr.msk.bf16.vlgmr.msra.gmra.mrb[0].mxu0 %vm1862_vm9, %v1820_v30  ;;  %v2790_v1 = vunpack.i.h.bf16 %v4864_v56  ;;  %v2834_v0 = vunpack.i.l.bf16 %v4865_v46  ;;  %v4871_v17 = vld [vmem:[#allocation23_spill] sm:$0xff] }
 0x120   : > { %3367 = vrot.lane.b32.xlu0 %v4860_v12, %s3482_s11  ;;  %2631 = vmatprep.mubr.msk.bf16.mxu1 %vm1862_vm9, %v1827_v32  ;;  %v2835_v8 = vunpack.i.h.bf16 %v4865_v46  ;;  %v2830_v48 = vunpack.i.h.bf16 %v4866_v25  ;;  %v2875_v40 = vunpack.i.h.bf16 %v4867_v14  ;;  %v2874_v2 = vunpack.i.l.bf16 %v4867_v14  ;;  %s3379_s11 = scalar_lea.vmem %s4744_s16, 4096 }
 0x121   : > { %v1805_v5 = vsel %vm1786_vm8, %v1772_v31, %v3079_v63  ;;  %v1806_v18 = vsel %vm1786_vm8, %v1773_v9, %v3080_v42  ;;  %v4421_v24 = vpop.permute.xlu1 %3092  ;;  %v1561_v28 = vsel %vm1555_vm1, %v232_v61, %v2750_v29  ;;  %v1562_v21 = vsel %vm1555_vm1, %v233_v52, %v2754_v34  ;;  %v4870_v42 = vld [vmem:[#allocation14_spill] sm:$0xff]  ;;  %p3380_p13 = scmp.ne.s32.totalorder %s4744_s16, %s3379_s11  ;;  %p3387_p4 = scmp.lt.s32.totalorder %s3385_s27, %s3379_s11 }
 0x122   : > { %v1828_v11 = vpack.c.bf16 %v1806_v18, %v1805_v5  ;;  %v4423_v38 = vpop.permute.xlu0 %3087  ;;  %v2870_v3 = vunpack.i.h.bf16 %v4868_v15  ;;  %v2869_v60 = vunpack.i.l.bf16 %v4868_v15  ;;  %v1563_v51 = vsel %vm1555_vm1, %v234_v27, %v2755_v4  ;;  %v4872_v5 = vld [vmem:[#allocation24_spill] sm:$0xff] }
 0x123   : > { %v1578_v36 = vsel %vm1555_vm1, %v249_v59, %v2794_v19  ;;  %v1579_v23 = vsel %vm1555_vm1, %v250_v41, %v2795_v7  ;;  %v1576_v47 = vsel %vm1555_vm1, %v247_v53, %v2789_v54  ;;  %v1577_v50 = vsel %vm1555_vm1, %v248_v26, %v2790_v1  ;;  %p3381_p0 = pnand %p3380_p13, %p3556_p3  ;;  %p3388_p5 = por %p3387_p4, %p3386_p2 }
 0x124   : > { %2632 = vmatmul.mubr.msk.bf16.vlgmr.msra.gmra.mrb[0].mxu1 %vm1862_vm9, %v1828_v11  ;;  %v1595_v10 = vsel %vm1588_vm2, %v1562_v21, %v2834_v0  ;;  %v2915_v30 = vunpack.i.h.bf16 %v4869_v37  ;;  %v2914_v55 = vunpack.i.l.bf16 %v4869_v37  ;;  %v1596_v49 = vsel %vm1588_vm2, %v1563_v51, %v2835_v8  ;;  %v4873_v51 = vld [vmem:[#allocation33_spill] sm:$0xff] }
 0x125   : > { %v4426_v39 = vpop.permute.xlu1 %3102  ;;  %v1594_v58 = vsel %vm1588_vm2, %v1561_v28, %v2830_v48  ;;  %v1611_v57 = vsel %vm1588_vm2, %v1578_v36, %v2874_v2  ;;  %v1612_v44 = vsel %vm1588_vm2, %v1579_v23, %v2875_v40  ;;  %v1609_v22 = vsel %vm1588_vm2, %v1576_v47, %v2869_v60  ;;  %p3382_p1 = pneg %p3381_p0 }
 0x126   : > { %v4430_v13 = vpop.permute.xlu0 %3097  ;;  %v1610_v43 = vsel %vm1588_vm2, %v1577_v50, %v2870_v3  ;;  %v2910_v63 = vunpack.i.h.bf16 %v4870_v42  ;;  %v2954_v31 = vunpack.i.l.bf16 %v4871_v17  ;;  %v2955_v12 = vunpack.i.h.bf16 %v4871_v17 }
 0x127   : > { %v2950_v18 = vunpack.i.h.bf16 %v4872_v5  ;;  %v2949_v11 = vunpack.i.l.bf16 %v4872_v5  ;;  %v3000_v20 = vunpack.i.h.bf16 %v4190_v35  ;;  %v1628_v29 = vsel %vm1621_vm3, %v1595_v10, %v2914_v55  ;;  %p3389_p6 = pnand %p3388_p5, %p3382_p1 }
 0x128   : > { %v1629_v6 = vsel %vm1621_vm3, %v1596_v49, %v2915_v30  ;;  %v3085_v34 = vunpack.i.h.bf16 %v4398_v33  ;;  %v3084_v61 = vunpack.i.l.bf16 %v4398_v33  ;;  %v3095_v4 = vunpack.i.h.bf16 %v4421_v24 }
 0x129   : > { %v4449_v62 = vpop.permute.xlu1 %3112  ;;  %v3094_v52 = vunpack.i.l.bf16 %v4421_v24  ;;  %v3090_v27 = vunpack.i.h.bf16 %v4423_v38  ;;  %v3089_v45 = vunpack.i.l.bf16 %v4423_v38  ;;  %v1627_v19 = vsel %vm1621_vm3, %v1594_v58, %v2910_v63 }
 0x12a   : > { %v4455_v16 = vpop.permute.xlu0 %3107  ;;  %v1644_v35 = vsel %vm1621_vm3, %v1611_v57, %v2954_v31  ;;  %v3105_v56 = vunpack.i.h.bf16 %v4426_v39  ;;  %v3104_v54 = vunpack.i.l.bf16 %v4426_v39  ;;  %v1645_v33 = vsel %vm1621_vm3, %v1612_v44, %v2955_v12 }
 0x12b   : > { %v1642_v41 = vsel %vm1621_vm3, %v1609_v22, %v2949_v11  ;;  %v1643_v24 = vsel %vm1621_vm3, %v1610_v43, %v2950_v18  ;;  %v1660_v1 = vsel %vm1654_vm4, %v1627_v19, %v3000_v20  ;;  %v3100_v46 = vunpack.i.h.bf16 %v4430_v13 }
 0x12c   : > { %v1675_v38 = vsel %vm1654_vm4, %v1642_v41, %v3084_v61  ;;  %v1676_v53 = vsel %vm1654_vm4, %v1643_v24, %v3085_v34  ;;  %v3099_v0 = vunpack.i.l.bf16 %v4430_v13  ;;  %v1677_v39 = vsel %vm1654_vm4, %v1644_v35, %v3094_v52 }
 0x12d   : > { %v4469_v32 = vpop.permute.xlu1 %3122  ;;  %v1678_v26 = vsel %vm1654_vm4, %v1645_v33, %v3095_v4  ;;  %v1661_v8 = vsel %vm1654_vm4, %v1628_v29, %v3089_v45  ;;  %v1662_v25 = vsel %vm1654_vm4, %v1629_v6, %v3090_v27  ;;  %v1708_v14 = vsel %vm1687_vm5, %v1675_v38, %v3104_v54 }
 0x12e   : > { %v3118_v9 = vpop.permute.xlu0 %3117  ;;  %v1709_v40 = vsel %vm1687_vm5, %v1676_v53, %v3105_v56  ;;  %v3115_v2 = vunpack.i.h.bf16 %v4449_v62  ;;  %v3114_v28 = vunpack.i.l.bf16 %v4449_v62  ;;  %v3110_v13 = vunpack.i.h.bf16 %v4455_v16 }
 0x12f   : > { %v3109_v15 = vunpack.i.l.bf16 %v4455_v16  ;;  %v3125_v3 = vunpack.i.h.bf16 %v4469_v32  ;;  %v3124_v60 = vunpack.i.l.bf16 %v4469_v32  ;;  %v1692_v36 = vsel %vm1687_vm5, %v4873_v51, %v3099_v0 }
 0x130   : > { %v1693_v23 = vsel %vm1687_vm5, %v1660_v1, %v3100_v46  ;;  %v3120_v47 = vunpack.i.h.bf16 %v3118_v9  ;;  %v3119_v50 = vunpack.i.l.bf16 %v3118_v9  ;;  %v1710_v49 = vsel %vm1687_vm5, %v1677_v39, %v3114_v28 }
 0x131   : > { %v3133_v7 = vpop.permute.xlu1 %3132  ;;  %v1711_v16 = vsel %vm1687_vm5, %v1678_v26, %v3115_v2  ;;  %v1694_v32 = vsel %vm1687_vm5, %v1661_v8, %v3109_v15  ;;  %v1695_v22 = vsel %vm1687_vm5, %v1662_v25, %v3110_v13  ;;  %v1741_v43 = vsel %vm1720_vm6, %v1708_v14, %v3124_v60 }
 0x132   : > { %v4491_v59 = vpop.permute.xlu0 %3127  ;;  %v3135_v10 = vunpack.i.h.bf16 %v3133_v7  ;;  %v3134_v37 = vunpack.i.l.bf16 %v3133_v7  ;;  %v1742_v42 = vsel %vm1720_vm6, %v1709_v40, %v3125_v3  ;;  %v1725_v63 = vsel %vm1720_vm6, %v1692_v36, %v3119_v50 }
 0x133   : > { %v1726_v17 = vsel %vm1720_vm6, %v1693_v23, %v3120_v47  ;;  %v3130_v31 = vunpack.i.h.bf16 %v4491_v59  ;;  %v3129_v9 = vunpack.i.l.bf16 %v4491_v59 }
 0x134   : > { %v1743_v12 = vsel %vm1720_vm6, %v1710_v49, %v3134_v37  ;;  %v1744_v5 = vsel %vm1720_vm6, %v1711_v16, %v3135_v10 }
 0x135   : > { %v3143_v48 = vpop.permute.xlu1 %3142  ;;  %v1727_v59 = vsel %vm1720_vm6, %v1694_v32, %v3129_v9  ;;  %v1728_v38 = vsel %vm1720_vm6, %v1695_v22, %v3130_v31  ;;  %v4874_v31 = vld [vmem:[#allocation27_spill] sm:$0xff] }
 0x136   : > { %v3138_v21 = vpop.permute.xlu0 %3137  ;;  %v3145_v30 = vunpack.i.h.bf16 %v3143_v48  ;;  %v3144_v62 = vunpack.i.l.bf16 %v3143_v48 }
 0x137   : > { %v3140_v58 = vunpack.i.h.bf16 %v3138_v21  ;;  %v3139_v57 = vunpack.i.l.bf16 %v3138_v21 }
 0x138   : > { %v1774_v18 = vsel %vm1753_vm7, %v1741_v43, %v3144_v62  ;;  %v1775_v11 = vsel %vm1753_vm7, %v1742_v42, %v3145_v30 }
 0x139   : > { %v3153_v55 = vpop.permute.xlu1 %3152  ;;  %v1758_v29 = vsel %vm1753_vm7, %v1725_v63, %v3139_v57  ;;  %v1759_v6 = vsel %vm1753_vm7, %v1726_v17, %v3140_v58 }
 0x13a   : > { %v3148_v44 = vpop.permute.xlu0 %3147  ;;  %v3155_v52 = vunpack.i.h.bf16 %v3153_v55  ;;  %v3154_v27 = vunpack.i.l.bf16 %v3153_v55 }
 0x13b   : > { %v3150_v19 = vunpack.i.h.bf16 %v3148_v44  ;;  %v3149_v35 = vunpack.i.l.bf16 %v3148_v44 }
 0x13c   : > { %v1776_v26 = vsel %vm1753_vm7, %v1743_v12, %v3154_v27  ;;  %v1777_v8 = vsel %vm1753_vm7, %v1744_v5, %v3155_v52  ;;  %v4875_v12 = vld [vmem:[#allocation28_spill] sm:$0xff]  ;;  %v4879_v52 = vld [vmem:[#allocation26_spill] sm:$0xff] }
 0x13d   : > { %v3163_v20 = vpop.permute.xlu1 %3162  ;;  %v1760_v14 = vsel %vm1753_vm7, %v1727_v59, %v3149_v35  ;;  %v1761_v40 = vsel %vm1753_vm7, %v1728_v38, %v3150_v19  ;;  %v4881_v19 = vld [vmem:[#allocation16_spill] sm:$0xff] }
 0x13e   : > { %v3165_v34 = vunpack.i.h.bf16 %v3163_v20  ;;  %v3164_v61 = vunpack.i.l.bf16 %v3163_v20  ;;  %v3158_v4 = vpop.permute.xlu0 %3157  ;;  %v4877_v20 = vld [vmem:[#allocation18_spill] sm:$0xff] }
 0x13f   : > { %v3160_v45 = vunpack.i.h.bf16 %v3158_v4  ;;  %v3159_v7 = vunpack.i.l.bf16 %v3158_v4 }
 0x140   : > { %v1807_v56 = vsel %vm1786_vm8, %v1774_v18, %v3164_v61  ;;  %v1808_v54 = vsel %vm1786_vm8, %v1775_v11, %v3165_v34  ;;  %v4876_v18 = vld [vmem:[#allocation17_spill] sm:$0xff] }
 0x141   : > { %v1829_v33 = vpack.c.bf16 %v1808_v54, %v1807_v56  ;;  %v1791_v41 = vsel %vm1786_vm8, %v1758_v29, %v3159_v7  ;;  %v1792_v24 = vsel %vm1786_vm8, %v1759_v6, %v3160_v45  ;;  %v3173_v1 = vpop.permute.xlu1 %3172  ;;  %v4878_v61 = vld [vmem:[#allocation25_spill] sm:$0xff]  ;;  %v4880_v45 = vld [vmem:[#allocation15_spill] sm:$0xff] }
 0x142   : > { %v1821_v53 = vpack.c.bf16 %v1792_v24, %v1791_v41  ;;  %v3175_v46 = vunpack.i.h.bf16 %v3173_v1  ;;  %v3174_v0 = vunpack.i.l.bf16 %v3173_v1  ;;  %v3168_v39 = vpop.permute.xlu0 %3167 }
 0x143   : > { %v3170_v25 = vunpack.i.h.bf16 %v3168_v39  ;;  %v3169_v48 = vunpack.i.l.bf16 %v3168_v39  ;;  %2635 = vmatprep.mubr.msk.bf16.mxu1 %vm1862_vm9, %v1829_v33 }
 0x144   : > { %v1809_v2 = vsel %vm1786_vm8, %v1776_v26, %v3174_v0  ;;  %v1810_v28 = vsel %vm1786_vm8, %v1777_v8, %v3175_v46  ;;  %2619 = vmatprep.mubr.msk.bf16.mxu0 %vm1862_vm9, %v1821_v53 }
 0x145   : > { %v1830_v21 = vpack.c.bf16 %v1810_v28, %v1809_v2  ;;  %v1793_v13 = vsel %vm1786_vm8, %v1760_v14, %v3169_v48  ;;  %v1794_v15 = vsel %vm1786_vm8, %v1761_v40, %v3170_v25  ;;  %v3183_v3 = vpop.permute.xlu1 %3182 }
 0x146   : > { %v1822_v60 = vpack.c.bf16 %v1794_v15, %v1793_v13  ;;  %v3178_v51 = vpop.permute.xlu0 %3177  ;;  %v3185_v55 = vunpack.i.h.bf16 %v3183_v3  ;;  %v3184_v49 = vunpack.i.l.bf16 %v3183_v3 }
 0x147   : > { %2636 = vmatmul.mubr.msk.bf16.gmra.mrb[4].mxu1 %vm1862_vm9, %v1830_v21  ;;  %v3180_v16 = vunpack.i.h.bf16 %v3178_v51  ;;  %v3179_v58 = vunpack.i.l.bf16 %v3178_v51 }
 0x148   : > { %2620 = vmatmul.mubr.msk.bf16.gmra.mrb[4].mxu0 %vm1862_vm9, %v1822_v60  ;;  %v1679_v9 = vsel %vm1654_vm4, %v4874_v31, %v3184_v49  ;;  %v1680_v5 = vsel %vm1654_vm4, %v4875_v12, %v3185_v55 }
 0x149   : > { %v3193_v36 = vpop.permute.xlu1 %3192  ;;  %v1663_v11 = vsel %vm1654_vm4, %v4876_v18, %v3179_v58  ;;  %v1664_v29 = vsel %vm1654_vm4, %v4877_v20, %v3180_v16 }
 0x14a   : > { %v3188_v23 = vpop.permute.xlu0 %3187  ;;  %v3195_v57 = vunpack.i.h.bf16 %v3193_v36  ;;  %v3194_v44 = vunpack.i.l.bf16 %v3193_v36 }
 0x14b   : > { %v3190_v32 = vunpack.i.h.bf16 %v3188_v23  ;;  %v3189_v22 = vunpack.i.l.bf16 %v3188_v23 }
 0x14c   : > { %v1681_v4 = vsel %vm1654_vm4, %v4878_v61, %v3194_v44  ;;  %v1682_v27 = vsel %vm1654_vm4, %v4879_v52, %v3195_v57 }
 0x14d   : > { %v3203_v47 = vpop.permute.xlu1 %3202  ;;  %v1665_v7 = vsel %vm1654_vm4, %v4880_v45, %v3189_v22  ;;  %v1666_v35 = vsel %vm1654_vm4, %v4881_v19, %v3190_v32 }
 0x14e   : > { %v3198_v50 = vpop.permute.xlu0 %3197  ;;  %v3205_v42 = vunpack.i.h.bf16 %v3203_v47  ;;  %v3204_v63 = vunpack.i.l.bf16 %v3203_v47 }
 0x14f   : > { %v3200_v6 = vunpack.i.h.bf16 %v3198_v50  ;;  %v3199_v34 = vunpack.i.l.bf16 %v3198_v50 }
 0x150   : > { %v1712_v54 = vsel %vm1687_vm5, %v1679_v9, %v3204_v63  ;;  %v1713_v59 = vsel %vm1687_vm5, %v1680_v5, %v3205_v42 }
 0x151   : > { %v3213_v10 = vpop.permute.xlu1 %3212  ;;  %v1696_v0 = vsel %vm1687_vm5, %v1663_v11, %v3199_v34  ;;  %v1697_v39 = vsel %vm1687_vm5, %v1664_v29, %v3200_v6 }
 0x152   : > { %v3208_v37 = vpop.permute.xlu0 %3207  ;;  %v3215_v33 = vunpack.i.h.bf16 %v3213_v10  ;;  %v3214_v41 = vunpack.i.l.bf16 %v3213_v10 }
 0x153   : > { %v3210_v1 = vunpack.i.h.bf16 %v3208_v37  ;;  %v3209_v38 = vunpack.i.l.bf16 %v3208_v37 }
 0x154   : > { %v1714_v28 = vsel %vm1687_vm5, %v1681_v4, %v3214_v41  ;;  %v1715_v21 = vsel %vm1687_vm5, %v1682_v27, %v3215_v33 }
 0x155   : > { %v3223_v30 = vpop.permute.xlu1 %3222  ;;  %v1698_v60 = vsel %vm1687_vm5, %v1665_v7, %v3209_v38  ;;  %v1699_v51 = vsel %vm1687_vm5, %v1666_v35, %v3210_v1 }
 0x156   : > { %v3218_v62 = vpop.permute.xlu0 %3217  ;;  %v3225_v53 = vunpack.i.h.bf16 %v3223_v30  ;;  %v3224_v46 = vunpack.i.l.bf16 %v3223_v30 }
 0x157   : > { %v3220_v26 = vunpack.i.h.bf16 %v3218_v62  ;;  %v3219_v8 = vunpack.i.l.bf16 %v3218_v62 }
 0x158   : > { %v1745_v36 = vsel %vm1720_vm6, %v1712_v54, %v3224_v46  ;;  %v1746_v23 = vsel %vm1720_vm6, %v1713_v59, %v3225_v53 }
 0x159   : > { %v3233_v43 = vpop.permute.xlu1 %3232  ;;  %v1729_v47 = vsel %vm1720_vm6, %v1696_v0, %v3219_v8  ;;  %v1730_v50 = vsel %vm1720_vm6, %v1697_v39, %v3220_v26 }
 0x15a   : > { %v4550_v17 = vpop.permute.xlu0 %3227  ;;  %v3235_v25 = vunpack.i.h.bf16 %v3233_v43  ;;  %v3234_v48 = vunpack.i.l.bf16 %v3233_v43 }
 0x15b   : > { %v3230_v10 = vunpack.i.h.bf16 %v4550_v17  ;;  %v3229_v37 = vunpack.i.l.bf16 %v4550_v17 }
 0x15c   : > { %v1747_v30 = vsel %vm1720_vm6, %v1714_v28, %v3234_v48  ;;  %v1748_v62 = vsel %vm1720_vm6, %v1715_v21, %v3235_v25 }
 0x15d   : > { %v3243_v56 = vpop.permute.xlu1 %3242  ;;  %v1731_v18 = vsel %vm1720_vm6, %v1698_v60, %v3229_v37  ;;  %v1732_v34 = vsel %vm1720_vm6, %v1699_v51, %v3230_v10  ;;  %v4882_v10 = vld [vmem:[#allocation31_spill] sm:$0xff] }
 0x15e   : > { %v3238_v24 = vpop.permute.xlu0 %3237  ;;  %v3245_v14 = vunpack.i.h.bf16 %v3243_v56  ;;  %v3244_v40 = vunpack.i.l.bf16 %v3243_v56 }
 0x15f   : > { %v3240_v13 = vunpack.i.h.bf16 %v3238_v24  ;;  %v3239_v15 = vunpack.i.l.bf16 %v3238_v24 }
 0x160   : > { %v1778_v55 = vsel %vm1753_vm7, %v1745_v36, %v3244_v40  ;;  %v1779_v49 = vsel %vm1753_vm7, %v1746_v23, %v3245_v14 }
 0x161   : > { %v3253_v2 = vpop.permute.xlu1 %3252  ;;  %v1762_v58 = vsel %vm1753_vm7, %v1729_v47, %v3239_v15  ;;  %v1763_v57 = vsel %vm1753_vm7, %v1730_v50, %v3240_v13 }
 0x162   : > { %v3248_v3 = vpop.permute.xlu0 %3247  ;;  %v3255_v43 = vunpack.i.h.bf16 %v3253_v2  ;;  %v3254_v42 = vunpack.i.l.bf16 %v3253_v2 }
 0x163   : > { %v3250_v31 = vunpack.i.h.bf16 %v3248_v3  ;;  %v3249_v9 = vunpack.i.l.bf16 %v3248_v3 }
 0x164   : > { %v1780_v45 = vsel %vm1753_vm7, %v1747_v30, %v3254_v42  ;;  %v1781_v7 = vsel %vm1753_vm7, %v1748_v62, %v3255_v43  ;;  %v4883_v30 = vld [vmem:[#allocation32_spill] sm:$0xff]  ;;  %v4887_v43 = vld [vmem:[#allocation30_spill] sm:$0xff] }
 0x165   : > { %v3263_v16 = vpop.permute.xlu1 %3262  ;;  %v1764_v56 = vsel %vm1753_vm7, %v1731_v18, %v3249_v9  ;;  %v1765_v54 = vsel %vm1753_vm7, %v1732_v34, %v3250_v31  ;;  %v4889_v31 = vld [vmem:[#allocation20_spill] sm:$0xff] }
 0x166   : > { %v3265_v44 = vunpack.i.h.bf16 %v3263_v16  ;;  %v3264_v32 = vunpack.i.l.bf16 %v3263_v16  ;;  %v3258_v22 = vpop.permute.xlu0 %3257  ;;  %v4885_v16 = vld [vmem:[#allocation22_spill] sm:$0xff] }
 0x167   : > { %v3260_v63 = vunpack.i.h.bf16 %v3258_v22  ;;  %v3259_v17 = vunpack.i.l.bf16 %v3258_v22 }
 0x168   : > { %v1811_v12 = vsel %vm1786_vm8, %v1778_v55, %v3264_v32  ;;  %v1812_v5 = vsel %vm1786_vm8, %v1779_v49, %v3265_v44  ;;  %v4884_v55 = vld [vmem:[#allocation21_spill] sm:$0xff] }
 0x169   : > { %v1831_v11 = vpack.c.bf16 %v1812_v5, %v1811_v12  ;;  %v1795_v20 = vsel %vm1786_vm8, %v1762_v58, %v3259_v17  ;;  %v1796_v29 = vsel %vm1786_vm8, %v1763_v57, %v3260_v63  ;;  %v3273_v6 = vpop.permute.xlu1 %3272  ;;  %v4886_v32 = vld [vmem:[#allocation29_spill] sm:$0xff]  ;;  %v4888_v63 = vld [vmem:[#allocation19_spill] sm:$0xff] }
 0x16a   : > { %v1823_v61 = vpack.c.bf16 %v1796_v29, %v1795_v20  ;;  %v3275_v4 = vunpack.i.h.bf16 %v3273_v6  ;;  %v3274_v52 = vunpack.i.l.bf16 %v3273_v6  ;;  %v3268_v27 = vpop.permute.xlu0 %3267 }
 0x16b   : > { %v3270_v19 = vunpack.i.h.bf16 %v3268_v27  ;;  %v3269_v35 = vunpack.i.l.bf16 %v3268_v27  ;;  %2639 = vmatprep.mubr.msk.bf16.mxu1 %vm1862_vm9, %v1831_v11 }
 0x16c   : > { %v1813_v59 = vsel %vm1786_vm8, %v1780_v45, %v3274_v52  ;;  %v1814_v33 = vsel %vm1786_vm8, %v1781_v7, %v3275_v4  ;;  %2623 = vmatprep.mubr.msk.bf16.mxu0 %vm1862_vm9, %v1823_v61 }
 0x16d   : > { %v1832_v41 = vpack.c.bf16 %v1814_v33, %v1813_v59  ;;  %v1797_v24 = vsel %vm1786_vm8, %v1764_v56, %v3269_v35  ;;  %v1798_v1 = vsel %vm1786_vm8, %v1765_v54, %v3270_v19  ;;  %v3283_v38 = vpop.permute.xlu1 %3282 }
 0x16e   : > { %v1824_v53 = vpack.c.bf16 %v1798_v1, %v1797_v24  ;;  %v3278_v46 = vpop.permute.xlu0 %3277  ;;  %v3285_v2 = vunpack.i.h.bf16 %v3283_v38  ;;  %v3284_v28 = vunpack.i.l.bf16 %v3283_v38 }
 0x16f   : > { %2640 = vmatmul.mubr.msk.bf16.gmra.mrb[8].mxu1 %vm1862_vm9, %v1832_v41  ;;  %v3280_v21 = vunpack.i.h.bf16 %v3278_v46  ;;  %v3279_v13 = vunpack.i.l.bf16 %v3278_v46 }
 0x170   : > { %2624 = vmatmul.mubr.msk.bf16.gmra.mrb[8].mxu0 %vm1862_vm9, %v1824_v53  ;;  %v1683_v37 = vsel %vm1654_vm4, %v4882_v10, %v3284_v28  ;;  %v1684_v62 = vsel %vm1654_vm4, %v4883_v30, %v3285_v2 }
 0x171   : > { %v3293_v0 = vpop.permute.xlu1 %3292  ;;  %v1667_v49 = vsel %vm1654_vm4, %v4884_v55, %v3279_v13  ;;  %v1668_v58 = vsel %vm1654_vm4, %v4885_v16, %v3280_v21 }
 0x172   : > { %v3288_v39 = vpop.permute.xlu0 %3287  ;;  %v3295_v15 = vunpack.i.h.bf16 %v3293_v0  ;;  %v3294_v3 = vunpack.i.l.bf16 %v3293_v0 }
 0x173   : > { %v3290_v60 = vunpack.i.h.bf16 %v3288_v39  ;;  %v3289_v51 = vunpack.i.l.bf16 %v3288_v39 }
 0x174   : > { %v1685_v22 = vsel %vm1654_vm4, %v4886_v32, %v3294_v3  ;;  %v1686_v42 = vsel %vm1654_vm4, %v4887_v43, %v3295_v15 }
 0x175   : > { %v3303_v26 = vpop.permute.xlu1 %3302  ;;  %v1669_v17 = vsel %vm1654_vm4, %v4888_v63, %v3289_v51  ;;  %v1670_v9 = vsel %vm1654_vm4, %v4889_v31, %v3290_v60 }
 0x176   : > { %v3298_v8 = vpop.permute.xlu0 %3297  ;;  %v3305_v23 = vunpack.i.h.bf16 %v3303_v26  ;;  %v3304_v47 = vunpack.i.l.bf16 %v3303_v26 }
 0x177   : > { %v3300_v57 = vunpack.i.h.bf16 %v3298_v8  ;;  %v3299_v44 = vunpack.i.l.bf16 %v3298_v8 }
 0x178   : > { %v1716_v5 = vsel %vm1687_vm5, %v1683_v37, %v3304_v47  ;;  %v1717_v18 = vsel %vm1687_vm5, %v1684_v62, %v3305_v23 }
 0x179   : > { %v3313_v25 = vpop.permute.xlu1 %3312  ;;  %v1700_v52 = vsel %vm1687_vm5, %v1667_v49, %v3299_v44  ;;  %v1701_v27 = vsel %vm1687_vm5, %v1668_v58, %v3300_v57 }
 0x17a   : > { %v3308_v48 = vpop.permute.xlu0 %3307  ;;  %v3315_v11 = vunpack.i.h.bf16 %v3313_v25  ;;  %v3314_v20 = vunpack.i.l.bf16 %v3313_v25 }
 0x17b   : > { %v3310_v6 = vunpack.i.h.bf16 %v3308_v48  ;;  %v3309_v34 = vunpack.i.l.bf16 %v3308_v48 }
 0x17c   : > { %v1718_v33 = vsel %vm1687_vm5, %v1685_v22, %v3314_v20  ;;  %v1719_v41 = vsel %vm1687_vm5, %v1686_v42, %v3315_v11 }
 0x17d   : > { %v3323_v14 = vpop.permute.xlu1 %3322  ;;  %v1702_v53 = vsel %vm1687_vm5, %v1669_v17, %v3309_v34  ;;  %v1703_v46 = vsel %vm1687_vm5, %v1670_v9, %v3310_v6 }
 0x17e   : > { %v3318_v40 = vpop.permute.xlu0 %3317  ;;  %v3325_v61 = vunpack.i.h.bf16 %v3323_v14  ;;  %v3324_v4 = vunpack.i.l.bf16 %v3323_v14 }
 0x17f   : > { %v3320_v45 = vunpack.i.h.bf16 %v3318_v40  ;;  %v3319_v7 = vunpack.i.l.bf16 %v3318_v40 }
 0x180   : > { %v1749_v0 = vsel %vm1720_vm6, %v1716_v5, %v3324_v4  ;;  %v1750_v39 = vsel %vm1720_vm6, %v1717_v18, %v3325_v61  ;;  %v4666_v61 = vld [vmem:[%s4806_s2] ss:$0 sm:$0xff] }
 0x181   : > { %v3333_v36 = vpop.permute.xlu1 %3332  ;;  %v1733_v26 = vsel %vm1720_vm6, %v1700_v52, %v3319_v7  ;;  %v1734_v8 = vsel %vm1720_vm6, %v1701_v27, %v3320_v45 }
 0x182   : > { %v4606_v50 = vpop.permute.xlu0 %3327  ;;  %v3335_v19 = vunpack.i.h.bf16 %v3333_v36  ;;  %v3334_v35 = vunpack.i.l.bf16 %v3333_v36 }
 0x183   : > { %v3330_v25 = vunpack.i.h.bf16 %v4606_v50  ;;  %v3329_v48 = vunpack.i.l.bf16 %v4606_v50 }
 0x184   : > { %v1751_v14 = vsel %vm1720_vm6, %v1718_v33, %v3334_v35  ;;  %v1752_v40 = vsel %vm1720_vm6, %v1719_v41, %v3335_v19 }
 0x185   : > { %v3343_v12 = vpop.permute.xlu1 %3342  ;;  %v1735_v55 = vsel %vm1720_vm6, %v1702_v53, %v3329_v48  ;;  %v1736_v44 = vsel %vm1720_vm6, %v1703_v46, %v3330_v25 }
 0x186   : > { %v3338_v29 = vpop.permute.xlu0 %3337  ;;  %v3345_v56 = vunpack.i.h.bf16 %v3343_v12  ;;  %v3344_v54 = vunpack.i.l.bf16 %v3343_v12 }
 0x187   : > { %v3340_v24 = vunpack.i.h.bf16 %v3338_v29  ;;  %v3339_v1 = vunpack.i.l.bf16 %v3338_v29 }
 0x188   : > { %v1782_v2 = vsel %vm1753_vm7, %v1749_v0, %v3344_v54  ;;  %v1783_v28 = vsel %vm1753_vm7, %v1750_v39, %v3345_v56 }
 0x189   : > { %v3353_v59 = vpop.permute.xlu1 %3352  ;;  %v1766_v13 = vsel %vm1753_vm7, %v1733_v26, %v3339_v1  ;;  %v1767_v15 = vsel %vm1753_vm7, %v1734_v8, %v3340_v24 }
 0x18a   : > { %v3348_v38 = vpop.permute.xlu0 %3347  ;;  %v3355_v36 = vunpack.i.h.bf16 %v3353_v59  ;;  %v3354_v23 = vunpack.i.l.bf16 %v3353_v59 }
 0x18b   : > { %v3350_v10 = vunpack.i.h.bf16 %v3348_v38  ;;  %v3349_v37 = vunpack.i.l.bf16 %v3348_v38 }
 0x18c   : > { %v1784_v63 = vsel %vm1753_vm7, %v1751_v14, %v3354_v23  ;;  %v1785_v17 = vsel %vm1753_vm7, %v1752_v40, %v3355_v36 }
 0x18d   : > { %v3363_v21 = vpop.permute.xlu1 %3362  ;;  %v1768_v12 = vsel %vm1753_vm7, %v1735_v55, %v3349_v37  ;;  %v1769_v5 = vsel %vm1753_vm7, %v1736_v44, %v3350_v10 }
 0x18e   : > { %v3365_v3 = vunpack.i.h.bf16 %v3363_v21  ;;  %v3364_v60 = vunpack.i.l.bf16 %v3363_v21  ;;  %v3358_v51 = vpop.permute.xlu0 %3357 }
 0x18f   : > { %v3360_v47 = vunpack.i.h.bf16 %v3358_v51  ;;  %v3359_v50 = vunpack.i.l.bf16 %v3358_v51 }
 0x190   : > { %v1815_v30 = vsel %vm1786_vm8, %v1782_v2, %v3364_v60  ;;  %v1816_v62 = vsel %vm1786_vm8, %v1783_v28, %v3365_v3 }
 0x191   : > { %v1833_v49 = vpack.c.bf16 %v1816_v62, %v1815_v30  ;;  %v1799_v16 = vsel %vm1786_vm8, %v1766_v13, %v3359_v50  ;;  %v1800_v58 = vsel %vm1786_vm8, %v1767_v15, %v3360_v47  ;;  %v3373_v57 = vpop.permute.xlu1 %3372 }
 0x192   : > { %v1825_v32 = vpack.c.bf16 %v1800_v58, %v1799_v16  ;;  %v3375_v22 = vunpack.i.h.bf16 %v3373_v57  ;;  %v3374_v43 = vunpack.i.l.bf16 %v3373_v57  ;;  %v3368_v42 = vpop.permute.xlu0 %3367 }
 0x193   : > { %v3370_v31 = vunpack.i.h.bf16 %v3368_v42  ;;  %v3369_v9 = vunpack.i.l.bf16 %v3368_v42  ;;  %2643 = vmatprep.mubr.msk.bf16.mxu1 %vm1862_vm9, %v1833_v49 }
 0x194   : > { %v1817_v18 = vsel %vm1786_vm8, %v1784_v63, %v3374_v43  ;;  %v1818_v11 = vsel %vm1786_vm8, %v1785_v17, %v3375_v22  ;;  %2627 = vmatprep.mubr.msk.bf16.mxu0 %vm1862_vm9, %v1825_v32 }
 0x195   : > { %v1834_v20 = vpack.c.bf16 %v1818_v11, %v1817_v18  ;;  %v1801_v29 = vsel %vm1786_vm8, %v1768_v12, %v3369_v9  ;;  %v1802_v6 = vsel %vm1786_vm8, %v1769_v5, %v3370_v31 }
 0x196   : > { %v1826_v34 = vpack.c.bf16 %v1802_v6, %v1801_v29 }
 0x197   : > { %2644 = vmatmul.mubr.msk.bf16.gmra.mrb[12].mxu1 %vm1862_vm9, %v1834_v20 }
 0x198   : > { %2628 = vmatmul.mubr.msk.bf16.gmra.mrb[12].mxu0 %vm1862_vm9, %v1826_v34 }
 0x1f2   : > { %v2617_v4 = vpop.f32.mrb[0].mxu0 }
 0x1f3   : > { %v1958_v52 = vadd.f32 %v2617_v4, %v4666_v61  ;;  %v1949_v27 = vpop.f32.mrb[1].mxu0 }
 0x1f4   : > { %v1950_v45 = vadd.f32 %v4666_v61, %v1949_v27  ;;  %v2618_v7 = vpop.f32.mrb[2].mxu0 }
 0x1f5   : > { %v2078_v19 = vmax.f32 %v1958_v52, 0.0  ;;  %v1961_v35 = vadd.f32 %v2618_v7, %v4666_v61  ;;  %v1952_v56 = vpop.f32.mrb[3].mxu0 }
 0x1f6   : > { %v2076_v54 = vmax.f32 %v1950_v45, 0.0  ;;  %v1953_v59 = vadd.f32 %v4666_v61, %v1952_v56 }
 0x1f7   : > { %2110 = vst [vmem:[%s4674_s28 + $0x10] sm:$0xff] %v2078_v19  ;;  %v2079_v33 = vmax.f32 %v1961_v35, 0.0  ;;  %v2633_v41 = vpop.f32.mrb[0].mxu1 }
 0x1f8   : > { %2108 = vst [vmem:[%s4674_s28] sm:$0xff] %v2076_v54  ;;  %v2077_v24 = vmax.f32 %v1953_v59, 0.0  ;;  %v2022_v1 = vadd.f32 %v2633_v41, %v4666_v61  ;;  %v2013_v38 = vpop.f32.mrb[1].mxu1 }
 0x1f9   : > { %2111 = vst [vmem:[%s4674_s28 + $0x18] sm:$0xff] %v2079_v33  ;;  %v2014_v53 = vadd.f32 %v4666_v61, %v2013_v38  ;;  %v2634_v46 = vpop.f32.mrb[2].mxu1 }
 0x1fa   : > { %2109 = vst [vmem:[%s4674_s28 + $0x8] sm:$0xff] %v2077_v24  ;;  %v2094_v0 = vmax.f32 %v2022_v1, 0.0  ;;  %v2025_v39 = vadd.f32 %v2634_v46, %v4666_v61  ;;  %v2016_v26 = vpop.f32.mrb[3].mxu1 }
 0x1fb   : > { %v2092_v8 = vmax.f32 %v2014_v53, 0.0  ;;  %v2017_v25 = vadd.f32 %v4666_v61, %v2016_v26 }
 0x1fc   : > { %2126 = vst [vmem:[%s4674_s28 + $0x90] sm:$0xff] %v2094_v0  ;;  %v2095_v48 = vmax.f32 %v2025_v39, 0.0 }
 0x1fd   : > { %2124 = vst [vmem:[%s4674_s28 + $0x80] sm:$0xff] %v2092_v8  ;;  %v2093_v14 = vmax.f32 %v2017_v25, 0.0 }
 0x1fe   : > { %2127 = vst [vmem:[%s4674_s28 + $0x98] sm:$0xff] %v2095_v48 }
 0x1ff   : > { %2125 = vst [vmem:[%s4674_s28 + $0x88] sm:$0xff] %v2093_v14 }
 0x21a   : > { %v2637_v40 = vpop.f32.mrb[4].mxu1 }
 0x21b   : > { %v2621_v2 = vpop.f32.mrb[4].mxu0  ;;  %v2038_v28 = vadd.f32 %v2637_v40, %v4666_v61  ;;  %v2029_v21 = vpop.f32.mrb[5].mxu1 }
 0x21c   : > { %v1974_v13 = vadd.f32 %v2621_v2, %v4666_v61  ;;  %v1965_v15 = vpop.f32.mrb[5].mxu0  ;;  %v2030_v3 = vadd.f32 %v4666_v61, %v2029_v21  ;;  %v2638_v60 = vpop.f32.mrb[6].mxu1 }
 0x21d   : > { %v2098_v51 = vmax.f32 %v2038_v28, 0.0  ;;  %v1966_v36 = vadd.f32 %v4666_v61, %v1965_v15  ;;  %v2622_v23 = vpop.f32.mrb[6].mxu0  ;;  %v2041_v47 = vadd.f32 %v2638_v60, %v4666_v61  ;;  %v2032_v50 = vpop.f32.mrb[7].mxu1 }
 0x21e   : > { %v2082_v10 = vmax.f32 %v1974_v13, 0.0  ;;  %v2096_v37 = vmax.f32 %v2030_v3, 0.0  ;;  %v1977_v30 = vadd.f32 %v2622_v23, %v4666_v61  ;;  %v1968_v62 = vpop.f32.mrb[7].mxu0  ;;  %v2033_v55 = vadd.f32 %v4666_v61, %v2032_v50 }
 0x21f   : > { %2130 = vst [vmem:[%s4674_s28 + $0xb0] sm:$0xff] %v2098_v51  ;;  %v2080_v49 = vmax.f32 %v1966_v36, 0.0  ;;  %v2099_v16 = vmax.f32 %v2041_v47, 0.0  ;;  %v1969_v58 = vadd.f32 %v4666_v61, %v1968_v62 }
 0x220   : > { %2114 = vst [vmem:[%s4674_s28 + $0x30] sm:$0xff] %v2082_v10  ;;  %2128 = vst [vmem:[%s4674_s28 + $0xa0] sm:$0xff] %v2096_v37  ;;  %v2083_v57 = vmax.f32 %v1977_v30, 0.0  ;;  %v2097_v44 = vmax.f32 %v2033_v55, 0.0 }
 0x221   : > { %2112 = vst [vmem:[%s4674_s28 + $0x20] sm:$0xff] %v2080_v49  ;;  %2131 = vst [vmem:[%s4674_s28 + $0xb8] sm:$0xff] %v2099_v16  ;;  %v2081_v32 = vmax.f32 %v1969_v58, 0.0 }
 0x222   : > { %2115 = vst [vmem:[%s4674_s28 + $0x38] sm:$0xff] %v2083_v57  ;;  %2129 = vst [vmem:[%s4674_s28 + $0xa8] sm:$0xff] %v2097_v44 }
 0x223   : > { %2113 = vst [vmem:[%s4674_s28 + $0x28] sm:$0xff] %v2081_v32 }
 0x242   : > { %v2641_v22 = vpop.f32.mrb[8].mxu1 }
 0x243   : > { %v2625_v43 = vpop.f32.mrb[8].mxu0  ;;  %v2054_v42 = vadd.f32 %v2641_v22, %v4666_v61  ;;  %v2045_v63 = vpop.f32.mrb[9].mxu1 }
 0x244   : > { %v1990_v17 = vadd.f32 %v2625_v43, %v4666_v61  ;;  %v1981_v31 = vpop.f32.mrb[9].mxu0  ;;  %v2046_v9 = vadd.f32 %v4666_v61, %v2045_v63  ;;  %v2642_v12 = vpop.f32.mrb[10].mxu1 }
 0x245   : > { %v2102_v5 = vmax.f32 %v2054_v42, 0.0  ;;  %v1982_v18 = vadd.f32 %v4666_v61, %v1981_v31  ;;  %v2626_v11 = vpop.f32.mrb[10].mxu0  ;;  %v2057_v20 = vadd.f32 %v2642_v12, %v4666_v61  ;;  %v2048_v29 = vpop.f32.mrb[11].mxu1 }
 0x246   : > { %v2086_v6 = vmax.f32 %v1990_v17, 0.0  ;;  %v2100_v34 = vmax.f32 %v2046_v9, 0.0  ;;  %v1993_v4 = vadd.f32 %v2626_v11, %v4666_v61  ;;  %v1984_v52 = vpop.f32.mrb[11].mxu0  ;;  %v2049_v27 = vadd.f32 %v4666_v61, %v2048_v29 }
 0x247   : > { %2134 = vst [vmem:[%s4674_s28 + $0xd0] sm:$0xff] %v2102_v5  ;;  %v2084_v45 = vmax.f32 %v1982_v18, 0.0  ;;  %v2103_v7 = vmax.f32 %v2057_v20, 0.0  ;;  %v1985_v19 = vadd.f32 %v4666_v61, %v1984_v52 }
 0x248   : > { %2118 = vst [vmem:[%s4674_s28 + $0x50] sm:$0xff] %v2086_v6  ;;  %2132 = vst [vmem:[%s4674_s28 + $0xc0] sm:$0xff] %v2100_v34  ;;  %v2087_v35 = vmax.f32 %v1993_v4, 0.0  ;;  %v2101_v56 = vmax.f32 %v2049_v27, 0.0 }
 0x249   : > { %2116 = vst [vmem:[%s4674_s28 + $0x40] sm:$0xff] %v2084_v45  ;;  %2135 = vst [vmem:[%s4674_s28 + $0xd8] sm:$0xff] %v2103_v7  ;;  %v2085_v54 = vmax.f32 %v1985_v19, 0.0 }
 0x24a   : > { %2119 = vst [vmem:[%s4674_s28 + $0x58] sm:$0xff] %v2087_v35  ;;  %2133 = vst [vmem:[%s4674_s28 + $0xc8] sm:$0xff] %v2101_v56 }
 0x24b   : > { %2117 = vst [vmem:[%s4674_s28 + $0x48] sm:$0xff] %v2085_v54 }
 0x26a   : > { %v2645_v59 = vpop.f32.mrb[12].mxu1 }
 0x26b   : > { %v2629_v33 = vpop.f32.mrb[12].mxu0  ;;  %v2070_v41 = vadd.f32 %v2645_v59, %v4666_v61  ;;  %v2061_v24 = vpop.f32.mrb[13].mxu1 }
 0x26c   : > { %v2006_v1 = vadd.f32 %v2629_v33, %v4666_v61  ;;  %v1997_v38 = vpop.f32.mrb[13].mxu0  ;;  %v2062_v53 = vadd.f32 %v4666_v61, %v2061_v24  ;;  %v2646_v46 = vpop.f32.mrb[14].mxu1 }
 0x26d   : > { %v2106_v0 = vmax.f32 %v2070_v41, 0.0  ;;  %v1998_v39 = vadd.f32 %v4666_v61, %v1997_v38  ;;  %v2630_v26 = vpop.f32.mrb[14].mxu0  ;;  %v2073_v8 = vadd.f32 %v2646_v46, %v4666_v61  ;;  %v2064_v25 = vpop.f32.mrb[15].mxu1 }
 0x26e   : > { %v2090_v48 = vmax.f32 %v2006_v1, 0.0  ;;  %v2104_v14 = vmax.f32 %v2062_v53, 0.0  ;;  %v2009_v40 = vadd.f32 %v2630_v26, %v4666_v61  ;;  %v2000_v2 = vpop.f32.mrb[15].mxu0  ;;  %v2065_v28 = vadd.f32 %v4666_v61, %v2064_v25 }
 0x26f   : > { %2138 = vst [vmem:[%s4674_s28 + $0xf0] sm:$0xff] %v2106_v0  ;;  %v2088_v21 = vmax.f32 %v1998_v39, 0.0  ;;  %v2107_v13 = vmax.f32 %v2073_v8, 0.0  ;;  %v2001_v15 = vadd.f32 %v4666_v61, %v2000_v2 }
 0x270   : > { %2122 = vst [vmem:[%s4674_s28 + $0x70] sm:$0xff] %v2090_v48  ;;  %2136 = vst [vmem:[%s4674_s28 + $0xe0] sm:$0xff] %v2104_v14  ;;  %v2091_v3 = vmax.f32 %v2009_v40, 0.0  ;;  %v2105_v60 = vmax.f32 %v2065_v28, 0.0 }
 0x271   : > { %2120 = vst [vmem:[%s4674_s28 + $0x60] sm:$0xff] %v2088_v21  ;;  %2139 = vst [vmem:[%s4674_s28 + $0xf8] sm:$0xff] %v2107_v13  ;;  %v2089_v51 = vmax.f32 %v2001_v15, 0.0 }
 0x272   : > { %2123 = vst [vmem:[%s4674_s28 + $0x78] sm:$0xff] %v2091_v3  ;;  %2137 = vst [vmem:[%s4674_s28 + $0xe8] sm:$0xff] %v2105_v60 }
 0x273   : > { %2121 = vst [vmem:[%s4674_s28 + $0x68] sm:$0xff] %v2089_v51 }
 0x274   : > { %3392 = shalt.err (!%p3389_p6)
}
 0x275   : > { %s3393_s10 = scalar_lea.hbm %s4740_s8, 4096  ;;  %s3397_s4 = scalar_lea.hbm %s4807_s3, 16384 }
 0x276   : > { %p3394_p7 = scmp.ne.s32.totalorder %s4740_s8, %s3393_s10  ;;  %p3398_p11 = scmp.lt.u32.totalorder %s4740_s8, %s4807_s3 }
 0x277   : > { %p3399_p12 = scmp.lt.u32.totalorder %s3397_s4, %s3393_s10  ;;  %p3401_p0 = scmp.lt.u32.totalorder %s3393_s10, %s4740_s8 }
 0x278   : > { %p3395_p9 = pnand %p3394_p7, %p3556_p3 }
 0x279   : > { %p3400_p13 = por %p3399_p12, %p3398_p11 }
 0x27a   : > { %p3396_p10 = pneg %p3395_p9 }
 0x27b   : > { %p3402_p1 = por %p3401_p0, %p3400_p13 }
 0x27d   : > { %p3403_p2 = pnand %p3402_p1, %p3396_p10 }
 0x27f   : > { %3406 = shalt.err (!%p3403_p2)
}
 0x280   : > { %s3484_s6 = smov 128  }
 0x281   : > { %2656 = dma.vmem_to_hbm [thread:$0]  (%p3556_p3), %s4744_s16, 4096, %s4740_s8, %s4751_s9, %s3484_s6, %s3484_s6, %s3476_s20  }
 0x282 PF: > { %p2662_p4 = scmp.ge.s32.totalorder %s3473_s19, 2  ;;  %s2172_s7 = sand.u32 1, %s3445_s12  }
 0x283   : > { %s2173_s11 = scalar_lea.sflag [#allocation3], %s2172_s7 }
 0x284   : > { %p2659_p5 = pnand %p2662_p4, %p3565_p8 }
 0x286   : > { %3440 = dma.done.wait (!%p2659_p5), %s2173_s11, 4096  }
 0x287   : > { %3442 = vsyncadd (!%p2659_p5), %s2173_s11, 4294963200  ;;  %s16_s19 = sadd.s32 1, %s3473_s19   ;;  %s4890_s12 = smov %s3449_s13 }
 0x288   : > { %p13_p6 = scmp.ge.s32.totalorder %s16_s19, 6   ;;  %s4891_s13 = smov %s3453_s14 }
 0x289   : > { %s4892_s14 = smov %s3574_s30  ;;  %s4893_s15 = smov %s3465_s17 }
 0x28a   : > { %s4894_s16 = smov %s3469_s18  ;;  %s4895_s17 = smov %s4898_s22 }
 0x28b   : > { %s4896_s18 = smov %s4902_s23  ;;  %15 = sbr.rel (!%p13_p6) target bundleno = 5 (0x5), region = 82 }
 0x292   :  { %2178 = vsyncpa [#allocation3], 1 }
 0x293   :  { %2180 = vsyncpa [#allocation3 + $0x1], 1 }

</bundles_post_ra>
